<compile_context>
chip_gen: v5e
topology: v5e:2x2
jax: 0.10.0
libtpu: 0.0.40
codegen_flags: <defaults>
</compile_context>

<pallas_src>
import jax
import jax.numpy as jnp
from jax.experimental import pallas as pl
from jax.experimental.pallas import tpu as pltpu  # noqa: F401  (kept for scaled-up variants)

# ---------------- tiny synthetic LLaVA-like config ----------------
VOCAB = 256
HIDDEN = 128
N_HEADS = 4
HEAD_DIM = HIDDEN // N_HEADS       # 32
FFN = 256
IMG_SIZE = 16
PATCH = 8
N_PATCH = (IMG_SIZE // PATCH) ** 2  # 4 image tokens
SEQ_TEXT = 8
SEQ_TOT = N_PATCH + SEQ_TEXT        # 12 total tokens per example
IGNORE_INDEX = -100
PATCH_DIM = 3 * PATCH * PATCH       # 192
VIS_DIM = 64


# ---------------- single fused Pallas kernel (whole forward) ----------------
def _fused_forward_kernel(
    # inputs
    x_img_ref,      # (BT, PATCH_DIM) bf16 : patch vecs at image rows, zeros at text rows
    x_txt_ref,      # (BT, HIDDEN)    bf16 : gathered text embeddings, zeros at image rows
    keymask_ref,    # (1, BT)         f32  : key validity (image=1, text=attention_mask)
    bstart_ref,     # (BT, 1)         i32  : flat index of the row's batch start
    targets_ref,    # (BT, 1)         i32  : shifted CE targets (-100 = ignore)
    w_vis_ref,      # (PATCH_DIM, H)  bf16 : folded patch-embed @ projector
    attn_nw_ref, wqkv_ref, wo_ref,
    mlp_nw_ref, w_gu_ref, w_down_ref,
    final_nw_ref, lm_head_ref,
    # outputs
    logits_ref,     # (BT, VOCAB) f32
    loss_ref,       # (1, 1)      f32
):
    f32 = jnp.float32
    bf16 = jnp.bfloat16
    bt = x_img_ref.shape[0]

    def mm(a, w):
        # Weights arrive in bf16 (cast at init -> astype is a no-op); only f32
        # register activations get cast.  f32 accumulation on the MXU.
        return jnp.dot(a.astype(bf16), w.astype(bf16), preferred_element_type=f32)

    def rms(x, w):
        var = jnp.mean(x * x, axis=-1, keepdims=True)
        return x * jax.lax.rsqrt(var + 1e-6) * w

    # ---- embedding: one bf16 vision matmul + pre-gathered text rows ----
    h = mm(x_img_ref[...], w_vis_ref[...]) + x_txt_ref[...].astype(f32)    # (BT, H)

    # ---- additive attention bias built in-register (no (B,T,T) HBM tensor) ----
    ri = jax.lax.broadcasted_iota(jnp.int32, (bt, bt), 0)
    ci = jax.lax.broadcasted_iota(jnp.int32, (bt, bt), 1)
    allowed = (ci <= ri) & (ci >= bstart_ref[...]) & (keymask_ref[...] > 0.0)
    bias = jnp.where(allowed, 0.0, -1e9).astype(f32)                       # (BT, BT)
    # NOTE: every query row keeps >=1 allowed key (image keys are never padded),
    # so the f32 softmax below never sees an all -1e9 row.

    # ---- attention block: fused QKV, all heads, everything in registers ----
    x = rms(h, attn_nw_ref[...])
    qkv = mm(x, wqkv_ref[...])                                             # (BT, 3H) f32
    scale = 1.0 / (HEAD_DIM ** 0.5)
    q = (qkv[:, :HIDDEN] * scale).astype(bf16)        # fold scale into q once
    kv = qkv[:, HIDDEN:].astype(bf16)                 # k | v halves, one cast
    head_outs = []
    for hd in range(N_HEADS):                                              # static unroll
        c = hd * HEAD_DIM
        q_h = q[:, c:c + HEAD_DIM]
        k_h = kv[:, c:c + HEAD_DIM]
        v_h = kv[:, HIDDEN + c:HIDDEN + c + HEAD_DIM]
        s = jax.lax.dot_general(
            q_h, k_h, (((1,), (1,)), ((), ())), preferred_element_type=f32)
        s = s + bias                                                       # f32 softmax
        m = jnp.max(s, axis=-1, keepdims=True)
        p = jnp.exp(s - m)
        l = jnp.sum(p, axis=-1, keepdims=True)
        o = jnp.dot(p.astype(bf16), v_h, preferred_element_type=f32)
        head_outs.append(o * pl.reciprocal(l, approx=True))
    attn_out = jnp.concatenate(head_outs, axis=-1)    # (BT, H) lane concat, in registers
    h = h + mm(attn_out, wo_ref[...])

    # ---- gated (SiLU) MLP block with fused gate|up matmul ----
    x = rms(h, mlp_nw_ref[...])
    gu = mm(x, w_gu_ref[...])                                              # (BT, 2*FFN)
    g = gu[:, :FFN]
    u = gu[:, FFN:]
    h = h + mm((g * jax.nn.sigmoid(g)) * u, w_down_ref[...])

    # ---- final norm + LM head (lane-dense (BT, VOCAB) output) ----
    x = rms(h, final_nw_ref[...])
    logits = mm(x, lm_head_ref[...])                                       # (BT, V) f32
    logits_ref[...] = logits

    # ---- shifted causal-LM CE, reduced to a scalar in-kernel ----
    targets = targets_ref[...]                                             # (BT, 1) i32
    lmax = jnp.max(logits, axis=-1, keepdims=True)
    lse = jnp.log(jnp.sum(jnp.exp(logits - lmax), axis=-1, keepdims=True)) + lmax
    viota = jax.lax.broadcasted_iota(jnp.int32, logits.shape, 1)
    label_logit = jnp.sum(
        jnp.where(viota == targets, logits, 0.0), axis=-1, keepdims=True)
    valid = (targets >= 0).astype(f32)                                     # ignore_index == -100
    per = jnp.where(targets >= 0, lse - label_logit, 0.0)
    loss_sum = jnp.sum(per, axis=0, keepdims=True)                         # (1, 1)
    cnt = jnp.sum(valid, axis=0, keepdims=True)                            # (1, 1)
    loss_ref[...] = loss_sum / jnp.maximum(cnt, 1.0)


def _fused_forward(x_img, x_txt, keymask, bstart, targets, params):
    bt = x_img.shape[0]
    return pl.pallas_call(
        _fused_forward_kernel,
        out_shape=(
            jax.ShapeDtypeStruct((bt, VOCAB), jnp.float32),   # logits (lane-dense)
            jax.ShapeDtypeStruct((1, 1), jnp.float32),        # loss
        ),
    )(
        x_img, x_txt, keymask, bstart, targets,
        params["w_vis"],
        params["attn_norm_w"], params["wqkv"], params["wo"],
        params["mlp_norm_w"], params["w_gate_up"], params["w_down"],
        params["final_norm_w"], params["lm_head"],
    )


# ---------------- parameters (deterministic synthetic init) ----------------
def init_params(key):
    ks = jax.random.split(key, 8)
    s = 0.02
    bf16 = jnp.bfloat16

    def nrm(k, shape):
        return jax.random.normal(k, shape, jnp.float32) * s

    patch_w = nrm(ks[1], (PATCH_DIM, VIS_DIM))
    proj_w = nrm(ks[2], (VIS_DIM, HIDDEN))

    return {
        # matmul weights shipped to the kernel in bf16 (cast once here)
        "embed_tokens": nrm(ks[0], (VOCAB, HIDDEN)).astype(bf16),
        "w_vis": (patch_w @ proj_w).astype(bf16),          # folded projector (f32 fold, one cast)
        "wqkv": nrm(ks[3], (HIDDEN, 3 * HIDDEN)).astype(bf16),   # fused q | k | v
        "wo": nrm(ks[4], (HIDDEN, HIDDEN)).astype(bf16),
        "w_gate_up": nrm(ks[5], (HIDDEN, 2 * FFN)).astype(bf16),  # fused gate | up
        "w_down": nrm(ks[6], (FFN, HIDDEN)).astype(bf16),
        "lm_head": nrm(ks[7], (HIDDEN, VOCAB)).astype(bf16),
        # norm weights stay f32 (VPU math is f32)
        "attn_norm_w": jnp.ones((1, HIDDEN), jnp.float32),
        "mlp_norm_w": jnp.ones((1, HIDDEN), jnp.float32),
        "final_norm_w": jnp.ones((1, HIDDEN), jnp.float32),
    }


# ---------------- forward (mirrors SentimentClassifier.forward) ----------------
@jax.jit
def sentiment_classifier_forward(params, input_ids, attention_mask, pixel_values, labels):
    b = input_ids.shape[0]
    t = SEQ_TOT
    bt = b * t

    # --- patchify NCHW pixel_values (input prep only; no activations touch HBM) ---
    pv = pixel_values.astype(jnp.float32)                                  # (B,3,16,16)
    patches = (
        pv.reshape(b, 3, IMG_SIZE // PATCH, PATCH, IMG_SIZE // PATCH, PATCH)
        .transpose(0, 2, 4, 1, 3, 5)                                       # (B,Hp,Wp,C,P,P)
        .reshape(b, N_PATCH, PATCH_DIM)
    )

    # --- flat-sequence inputs: per batch, image tokens then text tokens, zero-padded
    #     so the kernel builds h0 with one lane-dense matmul + one add (no concat) ---
    x_img = jnp.concatenate(
        [patches, jnp.zeros((b, SEQ_TEXT, PATCH_DIM), jnp.float32)], axis=1
    ).reshape(bt, PATCH_DIM).astype(jnp.bfloat16)

    # embedding row lookup (pure memory gather) done here; kernel gets a dense
    # (BT, HIDDEN) bf16 slab -- replaces the old (BT, VOCAB) f32 one-hot matmul.
    tok_emb = jnp.take(params["embed_tokens"], input_ids, axis=0)          # (B,S,H) bf16
    x_txt = jnp.concatenate(
        [jnp.zeros((b, N_PATCH, HIDDEN), tok_emb.dtype), tok_emb], axis=1
    ).reshape(bt, HIDDEN)

    # --- tiny mask metadata for the in-kernel causal+padding bias ---
    tok_mask = jnp.concatenate(
        [jnp.ones((b, N_PATCH), jnp.float32), attention_mask.astype(jnp.float32)], axis=1
    )                                                                       # (B,T)
    keymask = tok_mask.reshape(1, bt)
    bstart = (jnp.repeat(jnp.arange(b, dtype=jnp.int32), t) * t).reshape(bt, 1)

    # --- shifted causal-LM targets (image / padded / final positions -> ignore) ---
    text_labels = jnp.where(attention_mask > 0, labels, IGNORE_INDEX).astype(jnp.int32)
    full_labels = jnp.concatenate(
        [jnp.full((b, N_PATCH), IGNORE_INDEX, jnp.int32), text_labels], axis=1
    )                                                                       # (B,T)
    targets = jnp.concatenate(
        [full_labels[:, 1:], jnp.full((b, 1), IGNORE_INDEX, jnp.int32)], axis=1
    ).reshape(bt, 1)

    logits, loss = _fused_forward(x_img, x_txt, keymask, bstart, targets, params)

    return {"loss": loss[0, 0], "logits": logits.reshape(b, t, VOCAB)}


if __name__ == "__main__":
    key = jax.random.PRNGKey(0)
    k_par, k_ids, k_pix = jax.random.split(key, 3)

    params = init_params(k_par)

    B = 2
    input_ids = jax.random.randint(k_ids, (B, SEQ_TEXT), 0, VOCAB, dtype=jnp.int32)
    attention_mask = jnp.ones((B, SEQ_TEXT), jnp.int32)
    pixel_values = jax.random.normal(k_pix, (B, 3, IMG_SIZE, IMG_SIZE), jnp.float32)
    labels = input_ids  # causal-LM style labels

    out = sentiment_classifier_forward(
        params, input_ids, attention_mask, pixel_values, labels
    )
    out = jax.block_until_ready(out)

    assert out["logits"].shape == (B, SEQ_TOT, VOCAB)
    assert bool(jnp.isfinite(out["loss"]))
    print("KERNEL_OK")
</pallas_src>

<mosaic_0001>
module attributes {stable_mosaic.version = 11 : i64} {
  func.func @_fused_forward_kernel(%arg0: memref<24x192xbf16, #tpu.memory_space<vmem>>, %arg1: memref<24x128xbf16, #tpu.memory_space<vmem>>, %arg2: memref<1x24xf32, #tpu.memory_space<vmem>>, %arg3: memref<24x1xi32, #tpu.memory_space<vmem>>, %arg4: memref<24x1xi32, #tpu.memory_space<vmem>>, %arg5: memref<192x128xbf16, #tpu.memory_space<vmem>>, %arg6: memref<1x128xf32, #tpu.memory_space<vmem>>, %arg7: memref<128x384xbf16, #tpu.memory_space<vmem>>, %arg8: memref<128x128xbf16, #tpu.memory_space<vmem>>, %arg9: memref<1x128xf32, #tpu.memory_space<vmem>>, %arg10: memref<128x512xbf16, #tpu.memory_space<vmem>>, %arg11: memref<256x128xbf16, #tpu.memory_space<vmem>>, %arg12: memref<1x128xf32, #tpu.memory_space<vmem>>, %arg13: memref<128x256xbf16, #tpu.memory_space<vmem>>, %arg14: memref<24x256xf32, #tpu.memory_space<vmem>>, %arg15: memref<1x1xf32, #tpu.memory_space<vmem>>) attributes {dimension_semantics = [], scalar_prefetch = 0 : i64, scratch_operands = 0 : i64, tpu.core_type = #tpu.core_type<tc>} {
    %c0 = arith.constant 0 : index
    %c0_0 = arith.constant 0 : index
    %0 = vector.load %arg0[%c0, %c0_0] : memref<24x192xbf16, #tpu.memory_space<vmem>>, vector<24x192xbf16>
    %c0_1 = arith.constant 0 : index
    %c0_2 = arith.constant 0 : index
    %1 = vector.load %arg5[%c0_1, %c0_2] : memref<192x128xbf16, #tpu.memory_space<vmem>>, vector<192x128xbf16>
    %cst = arith.constant dense<0.000000e+00> : vector<24x128xf32>
    %2 = tpu.matmul %0, %1, %cst {dimension_numbers = #tpu.dot_dimension_numbers<[1], [0], [0], [1], [0, 0, 1, 1], [], []>} : vector<24x192xbf16>, vector<192x128xbf16>, vector<24x128xf32> -> vector<24x128xf32>
    %c0_3 = arith.constant 0 : index
    %c0_4 = arith.constant 0 : index
    %3 = vector.load %arg1[%c0_3, %c0_4] : memref<24x128xbf16, #tpu.memory_space<vmem>>, vector<24x128xbf16>
    %4 = arith.extf %3 : vector<24x128xbf16> to vector<24x128xf32>
    %5 = arith.addf %2, %4 : vector<24x128xf32>
    %6 = tpu.iota {dimensions = array<i32: 0>} : vector<24x24xi32>
    %7 = tpu.iota {dimensions = array<i32: 1>} : vector<24x24xi32>
    %8 = arith.cmpi sle, %7, %6 : vector<24x24xi32>
    %c0_5 = arith.constant 0 : index
    %c0_6 = arith.constant 0 : index
    %9 = vector.load %arg3[%c0_5, %c0_6] : memref<24x1xi32, #tpu.memory_space<vmem>>, vector<24x1xi32>
    %10 = vector.broadcast %9 : vector<24x1xi32> to vector<24x24xi32>
    %11 = arith.cmpi sge, %7, %10 : vector<24x24xi32>
    %12 = arith.andi %8, %11 : vector<24x24xi1>
    %c0_7 = arith.constant 0 : index
    %c0_8 = arith.constant 0 : index
    %13 = vector.load %arg2[%c0_7, %c0_8] : memref<1x24xf32, #tpu.memory_space<vmem>>, vector<1x24xf32>
    %cst_9 = arith.constant 0.000000e+00 : f32
    %14 = vector.broadcast %cst_9 : f32 to vector<1x24xf32>
    %15 = arith.cmpf ogt, %13, %14 : vector<1x24xf32>
    %16 = vector.broadcast %15 : vector<1x24xi1> to vector<24x24xi1>
    %17 = arith.andi %12, %16 : vector<24x24xi1>
    %cst_10 = arith.constant 0.000000e+00 : f32
    %cst_11 = arith.constant -1.000000e+09 : f32
    %18 = vector.broadcast %cst_10 : f32 to vector<24x24xf32>
    %19 = vector.broadcast %cst_11 : f32 to vector<24x24xf32>
    %20 = arith.select %17, %18, %19 : vector<24x24xi1>, vector<24x24xf32>
    %c0_12 = arith.constant 0 : index
    %c0_13 = arith.constant 0 : index
    %21 = vector.load %arg6[%c0_12, %c0_13] : memref<1x128xf32, #tpu.memory_space<vmem>>, vector<1x128xf32>
    %22 = arith.mulf %5, %5 : vector<24x128xf32>
    %cst_14 = arith.constant dense<0.000000e+00> : vector<24xf32>
    %23 = vector.multi_reduction <add>, %22, %cst_14 [1] : vector<24x128xf32> to vector<24xf32>
    %24 = vector.shape_cast %23 : vector<24xf32> to vector<24x1xf32>
    %cst_15 = arith.constant 1.280000e+02 : f32
    %25 = vector.broadcast %cst_15 : f32 to vector<24x1xf32>
    %26 = arith.divf %24, %25 : vector<24x1xf32>
    %cst_16 = arith.constant 9.99999997E-7 : f32
    %27 = vector.broadcast %cst_16 : f32 to vector<24x1xf32>
    %28 = arith.addf %26, %27 : vector<24x1xf32>
    %29 = math.rsqrt %28 : vector<24x1xf32>
    %30 = vector.broadcast %29 : vector<24x1xf32> to vector<24x128xf32>
    %31 = arith.mulf %5, %30 : vector<24x128xf32>
    %32 = vector.broadcast %21 : vector<1x128xf32> to vector<24x128xf32>
    %33 = arith.mulf %31, %32 : vector<24x128xf32>
    %c0_17 = arith.constant 0 : index
    %c0_18 = arith.constant 0 : index
    %34 = vector.load %arg7[%c0_17, %c0_18] : memref<128x384xbf16, #tpu.memory_space<vmem>>, vector<128x384xbf16>
    %35 = arith.truncf %33 : vector<24x128xf32> to vector<24x128xbf16>
    %cst_19 = arith.constant dense<0.000000e+00> : vector<24x384xf32>
    %36 = tpu.matmul %35, %34, %cst_19 {dimension_numbers = #tpu.dot_dimension_numbers<[1], [0], [0], [1], [0, 0, 1, 1], [], []>} : vector<24x128xbf16>, vector<128x384xbf16>, vector<24x384xf32> -> vector<24x384xf32>
    %37 = vector.extract_strided_slice %36 {offsets = [0, 0], sizes = [24, 128], strides = [1, 1]} : vector<24x384xf32> to vector<24x128xf32>
    %cst_20 = arith.constant 0.176776692 : f32
    %38 = vector.broadcast %cst_20 : f32 to vector<24x128xf32>
    %39 = arith.mulf %37, %38 : vector<24x128xf32>
    %40 = arith.truncf %39 : vector<24x128xf32> to vector<24x128xbf16>
    %41 = vector.extract_strided_slice %36 {offsets = [0, 128], sizes = [24, 256], strides = [1, 1]} : vector<24x384xf32> to vector<24x256xf32>
    %42 = arith.truncf %41 : vector<24x256xf32> to vector<24x256xbf16>
    %43 = vector.extract_strided_slice %40 {offsets = [0, 0], sizes = [24, 32], strides = [1, 1]} : vector<24x128xbf16> to vector<24x32xbf16>
    %44 = vector.extract_strided_slice %42 {offsets = [0, 0], sizes = [24, 32], strides = [1, 1]} : vector<24x256xbf16> to vector<24x32xbf16>
    %45 = vector.extract_strided_slice %42 {offsets = [0, 128], sizes = [24, 32], strides = [1, 1]} : vector<24x256xbf16> to vector<24x32xbf16>
    %cst_21 = arith.constant dense<0.000000e+00> : vector<24x24xf32>
    %46 = tpu.matmul %43, %44, %cst_21 {dimension_numbers = #tpu.dot_dimension_numbers<[1], [1], [0], [0], [0, 0, 1, 0], [], []>} : vector<24x32xbf16>, vector<24x32xbf16>, vector<24x24xf32> -> vector<24x24xf32>
    %47 = arith.addf %46, %20 : vector<24x24xf32>
    %cst_22 = arith.constant dense<0xFF800000> : vector<24xf32>
    %48 = vector.multi_reduction <maximumf>, %47, %cst_22 [1] : vector<24x24xf32> to vector<24xf32>
    %49 = vector.shape_cast %48 : vector<24xf32> to vector<24x1xf32>
    %50 = vector.broadcast %49 : vector<24x1xf32> to vector<24x24xf32>
    %51 = arith.subf %47, %50 : vector<24x24xf32>
    %52 = math.exp %51 : vector<24x24xf32>
    %cst_23 = arith.constant dense<0.000000e+00> : vector<24xf32>
    %53 = vector.multi_reduction <add>, %52, %cst_23 [1] : vector<24x24xf32> to vector<24xf32>
    %54 = vector.shape_cast %53 : vector<24xf32> to vector<24x1xf32>
    %55 = arith.truncf %52 : vector<24x24xf32> to vector<24x24xbf16>
    %cst_24 = arith.constant dense<0.000000e+00> : vector<24x32xf32>
    %56 = tpu.matmul %55, %45, %cst_24 {dimension_numbers = #tpu.dot_dimension_numbers<[1], [0], [0], [1], [0, 0, 1, 1], [], []>} : vector<24x24xbf16>, vector<24x32xbf16>, vector<24x32xf32> -> vector<24x32xf32>
    %57 = tpu.reciprocal %54 {approx = true} : vector<24x1xf32> -> vector<24x1xf32>
    %58 = vector.broadcast %57 : vector<24x1xf32> to vector<24x32xf32>
    %59 = arith.mulf %56, %58 : vector<24x32xf32>
    %60 = vector.extract_strided_slice %40 {offsets = [0, 32], sizes = [24, 32], strides = [1, 1]} : vector<24x128xbf16> to vector<24x32xbf16>
    %61 = vector.extract_strided_slice %42 {offsets = [0, 32], sizes = [24, 32], strides = [1, 1]} : vector<24x256xbf16> to vector<24x32xbf16>
    %62 = vector.extract_strided_slice %42 {offsets = [0, 160], sizes = [24, 32], strides = [1, 1]} : vector<24x256xbf16> to vector<24x32xbf16>
    %cst_25 = arith.constant dense<0.000000e+00> : vector<24x24xf32>
    %63 = tpu.matmul %60, %61, %cst_25 {dimension_numbers = #tpu.dot_dimension_numbers<[1], [1], [0], [0], [0, 0, 1, 0], [], []>} : vector<24x32xbf16>, vector<24x32xbf16>, vector<24x24xf32> -> vector<24x24xf32>
    %64 = arith.addf %63, %20 : vector<24x24xf32>
    %cst_26 = arith.constant dense<0xFF800000> : vector<24xf32>
    %65 = vector.multi_reduction <maximumf>, %64, %cst_26 [1] : vector<24x24xf32> to vector<24xf32>
    %66 = vector.shape_cast %65 : vector<24xf32> to vector<24x1xf32>
    %67 = vector.broadcast %66 : vector<24x1xf32> to vector<24x24xf32>
    %68 = arith.subf %64, %67 : vector<24x24xf32>
    %69 = math.exp %68 : vector<24x24xf32>
    %cst_27 = arith.constant dense<0.000000e+00> : vector<24xf32>
    %70 = vector.multi_reduction <add>, %69, %cst_27 [1] : vector<24x24xf32> to vector<24xf32>
    %71 = vector.shape_cast %70 : vector<24xf32> to vector<24x1xf32>
    %72 = arith.truncf %69 : vector<24x24xf32> to vector<24x24xbf16>
    %cst_28 = arith.constant dense<0.000000e+00> : vector<24x32xf32>
    %73 = tpu.matmul %72, %62, %cst_28 {dimension_numbers = #tpu.dot_dimension_numbers<[1], [0], [0], [1], [0, 0, 1, 1], [], []>} : vector<24x24xbf16>, vector<24x32xbf16>, vector<24x32xf32> -> vector<24x32xf32>
    %74 = tpu.reciprocal %71 {approx = true} : vector<24x1xf32> -> vector<24x1xf32>
    %75 = vector.broadcast %74 : vector<24x1xf32> to vector<24x32xf32>
    %76 = arith.mulf %73, %75 : vector<24x32xf32>
    %77 = vector.extract_strided_slice %40 {offsets = [0, 64], sizes = [24, 32], strides = [1, 1]} : vector<24x128xbf16> to vector<24x32xbf16>
    %78 = vector.extract_strided_slice %42 {offsets = [0, 64], sizes = [24, 32], strides = [1, 1]} : vector<24x256xbf16> to vector<24x32xbf16>
    %79 = vector.extract_strided_slice %42 {offsets = [0, 192], sizes = [24, 32], strides = [1, 1]} : vector<24x256xbf16> to vector<24x32xbf16>
    %cst_29 = arith.constant dense<0.000000e+00> : vector<24x24xf32>
    %80 = tpu.matmul %77, %78, %cst_29 {dimension_numbers = #tpu.dot_dimension_numbers<[1], [1], [0], [0], [0, 0, 1, 0], [], []>} : vector<24x32xbf16>, vector<24x32xbf16>, vector<24x24xf32> -> vector<24x24xf32>
    %81 = arith.addf %80, %20 : vector<24x24xf32>
    %cst_30 = arith.constant dense<0xFF800000> : vector<24xf32>
    %82 = vector.multi_reduction <maximumf>, %81, %cst_30 [1] : vector<24x24xf32> to vector<24xf32>
    %83 = vector.shape_cast %82 : vector<24xf32> to vector<24x1xf32>
    %84 = vector.broadcast %83 : vector<24x1xf32> to vector<24x24xf32>
    %85 = arith.subf %81, %84 : vector<24x24xf32>
    %86 = math.exp %85 : vector<24x24xf32>
    %cst_31 = arith.constant dense<0.000000e+00> : vector<24xf32>
    %87 = vector.multi_reduction <add>, %86, %cst_31 [1] : vector<24x24xf32> to vector<24xf32>
    %88 = vector.shape_cast %87 : vector<24xf32> to vector<24x1xf32>
    %89 = arith.truncf %86 : vector<24x24xf32> to vector<24x24xbf16>
    %cst_32 = arith.constant dense<0.000000e+00> : vector<24x32xf32>
    %90 = tpu.matmul %89, %79, %cst_32 {dimension_numbers = #tpu.dot_dimension_numbers<[1], [0], [0], [1], [0, 0, 1, 1], [], []>} : vector<24x24xbf16>, vector<24x32xbf16>, vector<24x32xf32> -> vector<24x32xf32>
    %91 = tpu.reciprocal %88 {approx = true} : vector<24x1xf32> -> vector<24x1xf32>
    %92 = vector.broadcast %91 : vector<24x1xf32> to vector<24x32xf32>
    %93 = arith.mulf %90, %92 : vector<24x32xf32>
    %94 = vector.extract_strided_slice %40 {offsets = [0, 96], sizes = [24, 32], strides = [1, 1]} : vector<24x128xbf16> to vector<24x32xbf16>
    %95 = vector.extract_strided_slice %42 {offsets = [0, 96], sizes = [24, 32], strides = [1, 1]} : vector<24x256xbf16> to vector<24x32xbf16>
    %96 = vector.extract_strided_slice %42 {offsets = [0, 224], sizes = [24, 32], strides = [1, 1]} : vector<24x256xbf16> to vector<24x32xbf16>
    %cst_33 = arith.constant dense<0.000000e+00> : vector<24x24xf32>
    %97 = tpu.matmul %94, %95, %cst_33 {dimension_numbers = #tpu.dot_dimension_numbers<[1], [1], [0], [0], [0, 0, 1, 0], [], []>} : vector<24x32xbf16>, vector<24x32xbf16>, vector<24x24xf32> -> vector<24x24xf32>
    %98 = arith.addf %97, %20 : vector<24x24xf32>
    %cst_34 = arith.constant dense<0xFF800000> : vector<24xf32>
    %99 = vector.multi_reduction <maximumf>, %98, %cst_34 [1] : vector<24x24xf32> to vector<24xf32>
    %100 = vector.shape_cast %99 : vector<24xf32> to vector<24x1xf32>
    %101 = vector.broadcast %100 : vector<24x1xf32> to vector<24x24xf32>
    %102 = arith.subf %98, %101 : vector<24x24xf32>
    %103 = math.exp %102 : vector<24x24xf32>
    %cst_35 = arith.constant dense<0.000000e+00> : vector<24xf32>
    %104 = vector.multi_reduction <add>, %103, %cst_35 [1] : vector<24x24xf32> to vector<24xf32>
    %105 = vector.shape_cast %104 : vector<24xf32> to vector<24x1xf32>
    %106 = arith.truncf %103 : vector<24x24xf32> to vector<24x24xbf16>
    %cst_36 = arith.constant dense<0.000000e+00> : vector<24x32xf32>
    %107 = tpu.matmul %106, %96, %cst_36 {dimension_numbers = #tpu.dot_dimension_numbers<[1], [0], [0], [1], [0, 0, 1, 1], [], []>} : vector<24x24xbf16>, vector<24x32xbf16>, vector<24x32xf32> -> vector<24x32xf32>
    %108 = tpu.reciprocal %105 {approx = true} : vector<24x1xf32> -> vector<24x1xf32>
    %109 = vector.broadcast %108 : vector<24x1xf32> to vector<24x32xf32>
    %110 = arith.mulf %107, %109 : vector<24x32xf32>
    %111 = tpu.concatenate %59, %76, %93, %110 in 1 : vector<24x32xf32>, vector<24x32xf32>, vector<24x32xf32>, vector<24x32xf32> -> vector<24x128xf32>
    %c0_37 = arith.constant 0 : index
    %c0_38 = arith.constant 0 : index
    %112 = vector.load %arg8[%c0_37, %c0_38] : memref<128x128xbf16, #tpu.memory_space<vmem>>, vector<128x128xbf16>
    %113 = arith.truncf %111 : vector<24x128xf32> to vector<24x128xbf16>
    %cst_39 = arith.constant dense<0.000000e+00> : vector<24x128xf32>
    %114 = tpu.matmul %113, %112, %cst_39 {dimension_numbers = #tpu.dot_dimension_numbers<[1], [0], [0], [1], [0, 0, 1, 1], [], []>} : vector<24x128xbf16>, vector<128x128xbf16>, vector<24x128xf32> -> vector<24x128xf32>
    %115 = arith.addf %5, %114 : vector<24x128xf32>
    %c0_40 = arith.constant 0 : index
    %c0_41 = arith.constant 0 : index
    %116 = vector.load %arg9[%c0_40, %c0_41] : memref<1x128xf32, #tpu.memory_space<vmem>>, vector<1x128xf32>
    %117 = arith.mulf %115, %115 : vector<24x128xf32>
    %cst_42 = arith.constant dense<0.000000e+00> : vector<24xf32>
    %118 = vector.multi_reduction <add>, %117, %cst_42 [1] : vector<24x128xf32> to vector<24xf32>
    %119 = vector.shape_cast %118 : vector<24xf32> to vector<24x1xf32>
    %cst_43 = arith.constant 1.280000e+02 : f32
    %120 = vector.broadcast %cst_43 : f32 to vector<24x1xf32>
    %121 = arith.divf %119, %120 : vector<24x1xf32>
    %cst_44 = arith.constant 9.99999997E-7 : f32
    %122 = vector.broadcast %cst_44 : f32 to vector<24x1xf32>
    %123 = arith.addf %121, %122 : vector<24x1xf32>
    %124 = math.rsqrt %123 : vector<24x1xf32>
    %125 = vector.broadcast %124 : vector<24x1xf32> to vector<24x128xf32>
    %126 = arith.mulf %115, %125 : vector<24x128xf32>
    %127 = vector.broadcast %116 : vector<1x128xf32> to vector<24x128xf32>
    %128 = arith.mulf %126, %127 : vector<24x128xf32>
    %c0_45 = arith.constant 0 : index
    %c0_46 = arith.constant 0 : index
    %129 = vector.load %arg10[%c0_45, %c0_46] : memref<128x512xbf16, #tpu.memory_space<vmem>>, vector<128x512xbf16>
    %130 = arith.truncf %128 : vector<24x128xf32> to vector<24x128xbf16>
    %cst_47 = arith.constant dense<0.000000e+00> : vector<24x512xf32>
    %131 = tpu.matmul %130, %129, %cst_47 {dimension_numbers = #tpu.dot_dimension_numbers<[1], [0], [0], [1], [0, 0, 1, 1], [], []>} : vector<24x128xbf16>, vector<128x512xbf16>, vector<24x512xf32> -> vector<24x512xf32>
    %132 = vector.extract_strided_slice %131 {offsets = [0, 0], sizes = [24, 256], strides = [1, 1]} : vector<24x512xf32> to vector<24x256xf32>
    %133 = vector.extract_strided_slice %131 {offsets = [0, 256], sizes = [24, 256], strides = [1, 1]} : vector<24x512xf32> to vector<24x256xf32>
    %134 = arith.negf %132 : vector<24x256xf32>
    %135 = math.exp %134 : vector<24x256xf32>
    %cst_48 = arith.constant 1.000000e+00 : f32
    %136 = vector.broadcast %cst_48 : f32 to vector<24x256xf32>
    %137 = arith.addf %136, %135 : vector<24x256xf32>
    %138 = arith.divf %136, %137 : vector<24x256xf32>
    %139 = arith.mulf %132, %138 : vector<24x256xf32>
    %140 = arith.mulf %139, %133 : vector<24x256xf32>
    %c0_49 = arith.constant 0 : index
    %c0_50 = arith.constant 0 : index
    %141 = vector.load %arg11[%c0_49, %c0_50] : memref<256x128xbf16, #tpu.memory_space<vmem>>, vector<256x128xbf16>
    %142 = arith.truncf %140 : vector<24x256xf32> to vector<24x256xbf16>
    %cst_51 = arith.constant dense<0.000000e+00> : vector<24x128xf32>
    %143 = tpu.matmul %142, %141, %cst_51 {dimension_numbers = #tpu.dot_dimension_numbers<[1], [0], [0], [1], [0, 0, 1, 1], [], []>} : vector<24x256xbf16>, vector<256x128xbf16>, vector<24x128xf32> -> vector<24x128xf32>
    %144 = arith.addf %115, %143 : vector<24x128xf32>
    %c0_52 = arith.constant 0 : index
    %c0_53 = arith.constant 0 : index
    %145 = vector.load %arg12[%c0_52, %c0_53] : memref<1x128xf32, #tpu.memory_space<vmem>>, vector<1x128xf32>
    %146 = arith.mulf %144, %144 : vector<24x128xf32>
    %cst_54 = arith.constant dense<0.000000e+00> : vector<24xf32>
    %147 = vector.multi_reduction <add>, %146, %cst_54 [1] : vector<24x128xf32> to vector<24xf32>
    %148 = vector.shape_cast %147 : vector<24xf32> to vector<24x1xf32>
    %cst_55 = arith.constant 1.280000e+02 : f32
    %149 = vector.broadcast %cst_55 : f32 to vector<24x1xf32>
    %150 = arith.divf %148, %149 : vector<24x1xf32>
    %cst_56 = arith.constant 9.99999997E-7 : f32
    %151 = vector.broadcast %cst_56 : f32 to vector<24x1xf32>
    %152 = arith.addf %150, %151 : vector<24x1xf32>
    %153 = math.rsqrt %152 : vector<24x1xf32>
    %154 = vector.broadcast %153 : vector<24x1xf32> to vector<24x128xf32>
    %155 = arith.mulf %144, %154 : vector<24x128xf32>
    %156 = vector.broadcast %145 : vector<1x128xf32> to vector<24x128xf32>
    %157 = arith.mulf %155, %156 : vector<24x128xf32>
    %c0_57 = arith.constant 0 : index
    %c0_58 = arith.constant 0 : index
    %158 = vector.load %arg13[%c0_57, %c0_58] : memref<128x256xbf16, #tpu.memory_space<vmem>>, vector<128x256xbf16>
    %159 = arith.truncf %157 : vector<24x128xf32> to vector<24x128xbf16>
    %cst_59 = arith.constant dense<0.000000e+00> : vector<24x256xf32>
    %160 = tpu.matmul %159, %158, %cst_59 {dimension_numbers = #tpu.dot_dimension_numbers<[1], [0], [0], [1], [0, 0, 1, 1], [], []>} : vector<24x128xbf16>, vector<128x256xbf16>, vector<24x256xf32> -> vector<24x256xf32>
    %c0_60 = arith.constant 0 : index
    %c0_61 = arith.constant 0 : index
    %161 = vector.load %arg14[%c0_60, %c0_61] : memref<24x256xf32, #tpu.memory_space<vmem>>, vector<24x256xf32>
    tpu.vector_store %arg14[%c0_60, %c0_61], %160 {strides = array<i32>} : memref<24x256xf32, #tpu.memory_space<vmem>>, vector<24x256xf32>,
    %c0_62 = arith.constant 0 : index
    %c0_63 = arith.constant 0 : index
    %162 = vector.load %arg4[%c0_62, %c0_63] : memref<24x1xi32, #tpu.memory_space<vmem>>, vector<24x1xi32>
    %cst_64 = arith.constant dense<0xFF800000> : vector<24xf32>
    %163 = vector.multi_reduction <maximumf>, %160, %cst_64 [1] : vector<24x256xf32> to vector<24xf32>
    %164 = vector.shape_cast %163 : vector<24xf32> to vector<24x1xf32>
    %165 = vector.broadcast %164 : vector<24x1xf32> to vector<24x256xf32>
    %166 = arith.subf %160, %165 : vector<24x256xf32>
    %167 = math.exp %166 : vector<24x256xf32>
    %cst_65 = arith.constant dense<0.000000e+00> : vector<24xf32>
    %168 = vector.multi_reduction <add>, %167, %cst_65 [1] : vector<24x256xf32> to vector<24xf32>
    %169 = vector.shape_cast %168 : vector<24xf32> to vector<24x1xf32>
    %170 = math.log %169 : vector<24x1xf32>
    %171 = arith.addf %170, %164 : vector<24x1xf32>
    %172 = tpu.iota {dimensions = array<i32: 1>} : vector<24x256xi32>
    %173 = vector.broadcast %162 : vector<24x1xi32> to vector<24x256xi32>
    %174 = arith.cmpi eq, %172, %173 : vector<24x256xi32>
    %cst_66 = arith.constant 0.000000e+00 : f32
    %175 = vector.broadcast %cst_66 : f32 to vector<24x256xf32>
    %176 = arith.select %174, %160, %175 : vector<24x256xi1>, vector<24x256xf32>
    %cst_67 = arith.constant dense<0.000000e+00> : vector<24xf32>
    %177 = vector.multi_reduction <add>, %176, %cst_67 [1] : vector<24x256xf32> to vector<24xf32>
    %178 = vector.shape_cast %177 : vector<24xf32> to vector<24x1xf32>
    %c0_i32 = arith.constant 0 : i32
    %179 = vector.broadcast %c0_i32 : i32 to vector<24x1xi32>
    %180 = arith.cmpi sge, %162, %179 : vector<24x1xi32>
    %181 = arith.extui %180 : vector<24x1xi1> to vector<24x1xi32>
    %182 = arith.sitofp %181 : vector<24x1xi32> to vector<24x1xf32>
    %c0_i32_68 = arith.constant 0 : i32
    %183 = vector.broadcast %c0_i32_68 : i32 to vector<24x1xi32>
    %184 = arith.cmpi sge, %162, %183 : vector<24x1xi32>
    %185 = arith.subf %171, %178 : vector<24x1xf32>
    %cst_69 = arith.constant 0.000000e+00 : f32
    %186 = vector.broadcast %cst_69 : f32 to vector<24x1xf32>
    %187 = arith.select %184, %185, %186 : vector<24x1xi1>, vector<24x1xf32>
    %cst_70 = arith.constant dense<0.000000e+00> : vector<1xf32>
    %188 = vector.multi_reduction <add>, %187, %cst_70 [0] : vector<24x1xf32> to vector<1xf32>
    %189 = vector.shape_cast %188 : vector<1xf32> to vector<1x1xf32>
    %cst_71 = arith.constant dense<0.000000e+00> : vector<1xf32>
    %190 = vector.multi_reduction <add>, %182, %cst_71 [0] : vector<24x1xf32> to vector<1xf32>
    %191 = vector.shape_cast %190 : vector<1xf32> to vector<1x1xf32>
    %cst_72 = arith.constant 1.000000e+00 : f32
    %192 = vector.broadcast %cst_72 : f32 to vector<1x1xf32>
    %193 = arith.maximumf %191, %192 : vector<1x1xf32>
    %194 = arith.divf %189, %193 : vector<1x1xf32>
    %c0_73 = arith.constant 0 : index
    %c0_74 = arith.constant 0 : index
    %195 = vector.load %arg15[%c0_73, %c0_74] : memref<1x1xf32, #tpu.memory_space<vmem>>, vector<1x1xf32>
    tpu.vector_store %arg15[%c0_73, %c0_74], %194 {strides = array<i32>} : memref<1x1xf32, #tpu.memory_space<vmem>>, vector<1x1xf32>,
    return
  }
}

</mosaic_0001>

<bundles_post_ra>
// kernel: sentiment_classifier_forward.1
= control target key start
LH: loop header
LB: loop body
LE: loop exit
PB: predicated region body
PF: predicated region fallthrough
CT: control target
= control target key end

     0   :  { %s3942_s0 = inlined_call_operand.vmem [shape: bf16[24,192], index: 0, kind: input, shape index: {}]   ;;  %s3943_s1 = inlined_call_operand.vmem [shape: bf16[24,128], index: 1, kind: input, shape index: {}]   ;;  %s3944_s2 = inlined_call_operand.vmem [shape: f32[1,24], index: 2, kind: input, shape index: {}]   ;;  %s3945_s3 = inlined_call_operand.vmem [shape: s32[24,1], index: 3, kind: input, shape index: {}]   ;;  %s3946_s4 = inlined_call_operand.vmem [shape: s32[24,1], index: 4, kind: input, shape index: {}]   ;;  %s3947_s5 = inlined_call_operand.vmem [shape: bf16[192,128], index: 5, kind: input, shape index: {}]   ;;  %s3948_s6 = inlined_call_operand.vmem [shape: f32[1,128], index: 6, kind: input, shape index: {}]   ;;  %s3949_s7 = inlined_call_operand.vmem [shape: bf16[128,384], index: 7, kind: input, shape index: {}]   ;;  %s3950_s8 = inlined_call_operand.vmem [shape: bf16[128,128], index: 8, kind: input, shape index: {}]   ;;  %s3951_s9 = inlined_call_operand.vmem [shape: f32[1,128], index: 9, kind: input, shape index: {}]   ;;  %s3952_s10 = inlined_call_operand.vmem [shape: bf16[128,512], index: 10, kind: input, shape index: {}]   ;;  %s3953_s11 = inlined_call_operand.vmem [shape: bf16[256,128], index: 11, kind: input, shape index: {}]   ;;  %s3954_s12 = inlined_call_operand.vmem [shape: f32[1,128], index: 12, kind: input, shape index: {}]   ;;  %s3955_s13 = inlined_call_operand.vmem [shape: bf16[128,256], index: 13, kind: input, shape index: {}]   ;;  %s3956_s14 = inlined_call_operand.vmem [shape: f32[24,256], index: 14, kind: output, shape index: {0}]   ;;  %s3957_s15 = inlined_call_operand.hbm [shape: f32[1,1], index: 15, kind: output, shape index: {1}]  }
   0x1   :  { %v2548_v0 = vld [vmem:[%s3947_s5 + $0x38] sm:$0xff]  ;;  %v2547_v2 = vld [vmem:[%s3947_s5 + $0x30] sm:$0xff]  ;;  %v2546_v4 = vld [vmem:[%s3947_s5 + $0x28] sm:$0xff] }
   0x2   :  { %v2552_v1 = vld [vmem:[%s3947_s5 + $0x58] sm:$0xff]  ;;  %178 = vmatpush.bf16.msra.mxu0 %v2548_v0  ;;  %v2551_v3 = vld [vmem:[%s3947_s5 + $0x50] sm:$0xff] }
   0x3   :  { %200 = vmatpush.bf16.msra.mxu1 %v2552_v1 }
   0x6   :  { %179 = vmatpush.bf16.msra.mxu0 %v2547_v2 }
   0x7   :  { %21 = vsyncpa [#allocation3], 0  ;;  %201 = vmatpush.bf16.msra.mxu1 %v2551_v3  ;;  %v2550_v5 = vld [vmem:[%s3947_s5 + $0x48] sm:$0xff]  ;;  %v2545_v6 = vld [vmem:[%s3947_s5 + $0x20] sm:$0xff]  ;;  %vm171_vm0 = vcmask 523264   ;;  %v2822_v52 = vmov 128.0  }
   0x8   :  { %v2549_v7 = vld [vmem:[%s3947_s5 + $0x40] sm:$0xff]  ;;  %v2076_v9 = vld [vmem:[%s3942_s0 + $0x8] sm:$0xf0]  ;;  %v2544_v10 = vld [vmem:[%s3947_s5 + $0x18] sm:$0xff]  ;;  %2684 = vrcp.f32 %v2822_v52  ;;  %vm555_vm11 = vcmask 261120   ;;  %s2825_s30 = smov 64  }
   0x9   :  { %v2539_v8 = vld [vmem:[%s3942_s0 + $0x4] sm:$0xf]  ;;  %v2543_v12 = vld [vmem:[%s3947_s5 + $0x10] sm:$0xff]  ;;  %v2542_v13 = vld [vmem:[%s3947_s5 + $0x8] sm:$0xff]  ;;  %vm628_vm12 = vcmask 1043456   ;;  %s2826_s16 = smov 32  }
   0xa   :  { %180 = vmatpush.bf16.msra.mxu0 %v2546_v4  ;;  %v2079_v11 = vor.u32 %v2539_v8, %v2076_v9  ;;  %v53_v14 = vld [vmem:[%s3942_s0 + $0x10] sm:$0xff]  ;;  %v2541_v15 = vld [vmem:[%s3947_s5] sm:$0xff]  ;;  %v2540_v17 = vld [vmem:[%s3942_s0 + $0x4] sm:$0xf0]  ;;  %s2061_s20 = sshll.u32 %s3957_s15, 4  ;;  %s2062_s20 = int_to_ptr.hbm [resolvable:$true] %s2061_s20 }
   0xb   :  { %202 = vmatpush.bf16.msra.mxu1 %v2550_v5  ;;  %v2074_v16 = vld [vmem:[%s3942_s0] sm:$0xf]  ;;  %v92_v18 = vunpack.c.h.b16 %v53_v14  ;;  %v91_v21 = vunpack.c.l.b16 %v53_v14  ;;  %v80_v36 = vld [vmem:[%s3943_s1 + $0x8] sm:$0xf]  ;;  %v2575_v46 = vld [vmem:[%s3949_s7 + $0xb0] sm:$0xf0] }
   0xc   :  { %v2075_v19 = vor.u32 %v2540_v17, %v2074_v16  ;;  %v2650_v25 = vld [vmem:[%s3943_s1] sm:$0xff]   ;;  %v83_v39 = vunpack.c.l.bf16 %v80_v36  ;;  %v2216_v45 = vld [vmem:[%s3949_s7 + $0xa8] sm:$0xf]  ;;  %v2574_v47 = vld [vmem:[%s3949_s7 + $0xac] sm:$0xf] }
   0xd   :  { %v96_v20 = vpack.c.b16 %v92_v18, %v92_v18  ;;  %v95_v22 = vpack.c.b16 %v91_v21, %v91_v21  ;;  %v2651_v26 = vunpack.c.l.bf16 %v2650_v25  ;;  %v2652_v32 = vunpack.c.h.bf16 %v2650_v25  ;;  %v2218_v49 = vld [vmem:[%s3949_s7 + $0xb4] sm:$0xf0]  ;;  %v2224_v50 = vld [vmem:[%s3949_s7 + $0xb0] sm:$0xf]  ;;  %v2576_v51 = vld [vmem:[%s3949_s7 + $0xb8] sm:$0xf0] }
   0xe   :  { %181 = vmatpush.bf16.msra.mxu0 %v2545_v6  ;;  %v2217_v48 = vor.u32 %v2575_v46, %v2216_v45  ;;  %v2221_v53 = vor.u32 %v2574_v47, %v2218_v49  ;;  %v2225_v54 = vor.u32 %v2576_v51, %v2224_v50  ;;  %v2204_v55 = vld [vmem:[%s3949_s7 + $0x90] sm:$0xf]  ;;  %v2572_v56 = vld [vmem:[%s3949_s7 + $0x98] sm:$0xf0]  ;;  %v2571_v57 = vld [vmem:[%s3949_s7 + $0x94] sm:$0xf]  ;;  %v3017_v0 = vpop.eup %2684 }
   0xf   :  { %203 = vmatpush.bf16.msra.mxu1 %v2549_v7  ;;  %v2205_v58 = vor.u32 %v2572_v56, %v2204_v55  ;;  %v2206_v59 = vld [vmem:[%s3949_s7 + $0x9c] sm:$0xf0]  ;;  %v2212_v60 = vld [vmem:[%s3949_s7 + $0x98] sm:$0xf]  ;;  %v2573_v61 = vld [vmem:[%s3949_s7 + $0xa0] sm:$0xf0]  ;;  %vm267_vm1 = vweird.f32 %v3017_v0 }
  0x10   :  { %476 = vmatpush.bf16.msra.mxu2 %v2217_v48  ;;  %494 = vmatpush.bf16.msra.mxu3 %v2221_v53  ;;  %v2209_v62 = vor.u32 %v2571_v57, %v2206_v59  ;;  %v2213_v63 = vor.u32 %v2573_v61, %v2212_v60  ;;  %v2192_v1 = vld [vmem:[%s3949_s7 + $0x78] sm:$0xf]  ;;  %v2569_v2 = vld [vmem:[%s3949_s7 + $0x80] sm:$0xf0]  ;;  %v2568_v3 = vld [vmem:[%s3949_s7 + $0x7c] sm:$0xf] }
  0x11   :  { %v2193_v4 = vor.u32 %v2569_v2, %v2192_v1  ;;  %v2194_v5 = vld [vmem:[%s3949_s7 + $0x84] sm:$0xf0]  ;;  %v2200_v6 = vld [vmem:[%s3949_s7 + $0x80] sm:$0xf]  ;;  %v2570_v7 = vld [vmem:[%s3949_s7 + $0x88] sm:$0xf0] }
  0x12   :  { %182 = vmatpush.bf16.msra.mxu0 %v2544_v10  ;;  %2128 = vmatmul.msk.bf16.vlgmr.msra.gmra.mxu1 %vm171_vm0, %v2079_v11  ;;  %v2197_v8 = vor.u32 %v2568_v3, %v2194_v5  ;;  %v2201_v9 = vor.u32 %v2570_v7, %v2200_v6  ;;  %v263_v10 = vmul.f32 128.0, %v3017_v0  ;;  %v2180_v11 = vld [vmem:[%s3949_s7 + $0x60] sm:$0xf]  ;;  %v2188_v16 = vld [vmem:[%s3949_s7 + $0x68] sm:$0xf] }
  0x13   :  { %512 = vmatpush.bf16.msrb.mxu1 %v2225_v54  ;;  %v2567_v17 = vld [vmem:[%s3949_s7 + $0x70] sm:$0xf0]  ;;  %v2168_v21 = vld [vmem:[%s3949_s7 + $0x48] sm:$0xf]  ;;  %v2170_v25 = vld [vmem:[%s3949_s7 + $0x54] sm:$0xf0] }
  0x14   :  { %477 = vmatpush.bf16.msra.mxu2 %v2205_v58  ;;  %495 = vmatpush.bf16.msra.mxu3 %v2209_v62  ;;  %v2158_v36 = vld [vmem:[%s3949_s7 + $0x3c] sm:$0xf0]  ;;  %v2557_v45 = vld [vmem:[%s3949_s7 + $0x20] sm:$0xf0]  ;;  %v2556_v46 = vld [vmem:[%s3949_s7 + $0x1c] sm:$0xf] }
  0x15   :  { %v2146_v48 = vld [vmem:[%s3949_s7 + $0x24] sm:$0xf0]  ;;  %v2152_v49 = vld [vmem:[%s3949_s7 + $0x20] sm:$0xf]  ;;  %v2558_v50 = vld [vmem:[%s3949_s7 + $0x28] sm:$0xf0] }
  0x16   :  { %183 = vmatpush.bf16.msra.mxu0 %v2543_v12  ;;  %v2566_v12 = vld [vmem:[%s3949_s7 + $0x68] sm:$0xf0]  ;;  %v2149_v51 = vor.u32 %v2556_v46, %v2146_v48  ;;  %v2153_v52 = vor.u32 %v2558_v50, %v2152_v49  ;;  %v2132_v54 = vld [vmem:[%s3949_s7] sm:$0xf]  ;;  %v2553_v56 = vld [vmem:[%s3949_s7 + $0x4] sm:$0xf] }
  0x17   :  { %513 = vmatpush.bf16.msrb.mxu1 %v2213_v63  ;;  %v2181_v14 = vor.u32 %v2566_v12, %v2180_v11  ;;  %v2554_v55 = vld [vmem:[%s3949_s7 + $0x8] sm:$0xf0]  ;;  %v2134_v59 = vld [vmem:[%s3949_s7 + $0xc] sm:$0xf0]  ;;  %v2140_v60 = vld [vmem:[%s3949_s7 + $0x8] sm:$0xf] }
  0x18   :  { %478 = vmatpush.bf16.msra.mxu2 %v2193_v4  ;;  %496 = vmatpush.bf16.msra.mxu3 %v2197_v8  ;;  %v2133_v58 = vor.u32 %v2554_v55, %v2132_v54  ;;  %v2555_v61 = vld [vmem:[%s3949_s7 + $0x10] sm:$0xf0]  ;;  %v2137_v63 = vor.u32 %v2553_v56, %v2134_v59  ;;  %v2823_v50 = vmov 0  }
  0x19   :  { %2665 = vset.pattern.permute.xlu0 %v2823_v50  ;;  %2664 = vset.pattern.permute.xlu1 %v2823_v50 }
  0x1a   :  { %184 = vmatpush.bf16.msra.mxu0 %v2542_v13  ;;  %v2565_v13 = vld [vmem:[%s3949_s7 + $0x64] sm:$0xf]  ;;  %2663 = vset.pattern.permute.xlu2 %v2823_v50 }
  0x1b   :  { %514 = vmatpush.bf16.msrb.mxu1 %v2201_v9 }
  0x1c   :  { %479 = vmatpush.bf16.msra.mxu2 %v2181_v14 }
  0x1e   :  { %185 = vmatpush.bf16.msra.mxu0 %v2541_v15  ;;  %v2182_v15 = vld [vmem:[%s3949_s7 + $0x6c] sm:$0xf0] }
  0x1f   :  { %v2185_v18 = vor.u32 %v2565_v13, %v2182_v15 }
  0x21   :  { %186 = vmatmul.bf16.vlgmr.msra.gmra.mxu0 %v2075_v19  ;;  %v2189_v19 = vor.u32 %v2567_v17, %v2188_v16  ;;  %497 = vmatpush.bf16.msra.mxu3 %v2185_v18 }
  0x22   :  { %2129 = vmatmul.msk.bf16.gmra.mxu1 %vm171_vm0, %v96_v20  ;;  %v264_v20 = vsub.f32 1.0, %v263_v10 }
  0x23   :  { %515 = vmatpush.bf16.msrb.mxu1 %v2189_v19 }
  0x31   :  { %191 = vmatmul.bf16.gmra.mxu0 %v95_v22  ;;  %v2563_v22 = vld [vmem:[%s3949_s7 + $0x50] sm:$0xf0] }
  0x8f   :  { %v205_v23 = vpop.f32.mrf.mxu1 }
  0x97   :  { %v207_v24 = vpop.f32.mrf.mxu1 }
  0x9e   :  { %v187_v27 = vpop.f32.mrf.mxu0 }
  0x9f   :  { %v188_v28 = vadd.f32 %v2651_v26, %v187_v27  ;;  %v210_v29 = vpop.f32.mrf.mxu1  ;;  %v2176_v26 = vld [vmem:[%s3949_s7 + $0x50] sm:$0xf]  ;;  %v2564_v27 = vld [vmem:[%s3949_s7 + $0x58] sm:$0xf0] }
  0xa1   :  { %v2966_v30 = vadd.f32 %v205_v23, %v188_v28  ;;  %v2562_v23 = vld [vmem:[%s3949_s7 + $0x4c] sm:$0xf] }
  0xa2   :  { %v2173_v28 = vor.u32 %v2562_v23, %v2170_v25 }
  0xa3   :  { %v253_v31 = vmul.f32 %v2966_v30, %v2966_v30 }
  0xa4   :  { %498 = vmatpush.bf16.msra.mxu3 %v2173_v28 }
  0xa5   :  { %256 = vadd.xlane.f32.xlu0 %v253_v31  ;;  %v265_v31 = vmul.f32 %v3017_v0, %v264_v20 }
  0xa6   :  { %v189_v33 = vpop.f32.mrf.mxu0 }
  0xa7   :  { %v190_v34 = vadd.f32 %v2652_v32, %v189_v33  ;;  %v212_v35 = vpop.f32.mrf.mxu1  ;;  %v2156_v32 = vld [vmem:[%s3949_s7 + $0x30] sm:$0xf]  ;;  %v2560_v33 = vld [vmem:[%s3949_s7 + $0x38] sm:$0xf0] }
  0xa8   :  { %v2157_v35 = vor.u32 %v2560_v33, %v2156_v32 }
  0xa9   :  { %v2973_v37 = vadd.f32 %v207_v24, %v190_v34  ;;  %v2169_v24 = vor.u32 %v2563_v22, %v2168_v21  ;;  %v2559_v34 = vld [vmem:[%s3949_s7 + $0x34] sm:$0xf] }
  0xab   :  { %v254_v38 = vmul.f32 %v2973_v37, %v2973_v37  ;;  %480 = vmatpush.bf16.msra.mxu2 %v2169_v24  ;;  %v2681_v24 = vld [vmem:[%s3948_s6] ss:$0 sm:$0xff]  ;;  %s2824_s6 = smov 96  }
  0xad   :  { %258 = vadd.xlane.f32.xlu0 %v254_v38  ;;  %v2164_v38 = vld [vmem:[%s3949_s7 + $0x38] sm:$0xf] }
  0xae   :  { %v192_v40 = vpop.f32.mrf.mxu0 }
  0xaf   :  { %v193_v41 = vadd.f32 %v192_v40, %v83_v39  ;;  %v2561_v39 = vld [vmem:[%s3949_s7 + $0x40] sm:$0xf0]  ;;  %v2161_v40 = vor.u32 %v2559_v34, %v2158_v36  ;;  %481 = vmatpush.bf16.msra.mxu2 %v2157_v35 }
  0xb1   :  { %v2977_v42 = vadd.f32 %v210_v29, %v193_v41  ;;  %v2177_v29 = vor.u32 %v2564_v27, %v2176_v26  ;;  %v2165_v41 = vor.u32 %v2561_v39, %v2164_v38  ;;  %499 = vmatpush.bf16.msra.mxu3 %v2161_v40 }
  0xb3   :  { %v255_v43 = vmul.f32 %v2977_v42, %v2977_v42  ;;  %516 = vmatpush.bf16.msrb.mxu1 %v2177_v29 }
  0xb5   :  { %260 = vadd.xlane.f32.xlu1 %v255_v43  ;;  %v266_v43 = vadd.f32 %v3017_v0, %v265_v31  ;;  %500 = vmatpush.bf16.msra.mxu3 %v2149_v51 }
  0xb6   :  { %v194_v44 = vpop.f32.mrf.mxu0 }
  0xb7   :  { %517 = vmatpush.bf16.msrb.mxu1 %v2165_v41  ;;  %v2144_v44 = vld [vmem:[%s3949_s7 + $0x18] sm:$0xf]  ;;  %v3114_v53 = vsel %vm267_vm1, %v3017_v0, %v266_v43  ;;  %v2141_v0 = vor.u32 %v2555_v61, %v2140_v60 }
  0xb8   :  { %v2145_v47 = vor.u32 %v2557_v45, %v2144_v44 }
  0xb9   :  { %501 = vmatpush.bf16.msra.mxu3 %v2137_v63 }
  0xba   :  { %482 = vmatpush.bf16.msra.mxu2 %v2145_v47 }
  0xbb   :  { %518 = vmatpush.bf16.msrb.mxu1 %v2153_v52 }
  0xbe   :  { %483 = vmatpush.bf16.msra.mxu2 %v2133_v58 }
  0xbf   :  { %519 = vmatpush.bf16.msrb.mxu1 %v2141_v0 }
 0x118   :  { %v257_v57 = vpop.xlane.xlu0 %256 }
 0x119   :  { %v269_v62 = vmul.f32 %v3114_v53, %v257_v57 }
 0x11b   :  { %v272_v1 = vadd.f32 1e-06, %v269_v62 }
 0x11d   :  { %2686 = vrsqrt.f32 %v272_v1  ;;  %vm281_vm3 = vweird.f32 %v272_v1 }
 0x120   :  { %v259_v2 = vpop.xlane.xlu0 %258 }
 0x121   :  { %v270_v3 = vmul.f32 %v3114_v53, %v259_v2 }
 0x123   :  { %v2687_v4 = vpop.eup %2686  ;;  %v273_v5 = vadd.f32 1e-06, %v270_v3 }
 0x124   :  { %v276_v6 = vmul.f32 %v2687_v4, %v272_v1  ;;  %vm282_vm2 = vweird.f32 %v2687_v4 }
 0x125   :  { %2688 = vrsqrt.f32 %v273_v5  ;;  %vm283_vm4 = vmor %vm281_vm3, %vm282_vm2  ;;  %vm291_vm6 = vweird.f32 %v273_v5 }
 0x126   :  { %v277_v7 = vmul.f32 %v2687_v4, %v276_v6 }
 0x128   :  { %v278_v8 = vmul.f32 0.5, %v277_v7  ;;  %v261_v9 = vpop.xlane.xlu1 %260 }
 0x129   :  { %v271_v10 = vmul.f32 %v3114_v53, %v261_v9 }
 0x12a   :  { %v279_v11 = vsub.f32 1.5, %v278_v8 }
 0x12b   :  { %v2689_v12 = vpop.eup %2688  ;;  %v274_v13 = vadd.f32 1e-06, %v271_v10 }
 0x12c   :  { %v286_v14 = vmul.f32 %v2689_v12, %v273_v5  ;;  %v280_v15 = vmul.f32 %v2687_v4, %v279_v11  ;;  %vm292_vm5 = vweird.f32 %v2689_v12 }
 0x12d   :  { %2690 = vrsqrt.f32 %v274_v13  ;;  %vm293_vm7 = vmor %vm291_vm6, %vm292_vm5  ;;  %vm301_vm8 = vweird.f32 %v274_v13 }
 0x12e   :  { %v287_v16 = vmul.f32 %v2689_v12, %v286_v14  ;;  %v284_v18 = vsel %vm283_vm4, %v2687_v4, %v280_v15 }
 0x12f   :  { %v305_v23 = vmul.f32 %v284_v18, %v2966_v30  ;;  %v225_v18 = vld [vmem:[%s3945_s3 + $0x10] sm:$0xff] }
 0x130   :  { %v288_v17 = vmul.f32 0.5, %v287_v16 }
 0x131   :  { %v311_v29 = vmul.f32 %v2681_v24, %v305_v23 }
 0x132   :  { %v289_v19 = vsub.f32 1.5, %v288_v17 }
 0x133   :  { %v2691_v20 = vpop.eup %2690 }
 0x134   :  { %v290_v21 = vmul.f32 %v2689_v12, %v289_v19  ;;  %v296_v22 = vmul.f32 %v2691_v20, %v274_v13  ;;  %vm302_vm9 = vweird.f32 %v2691_v20  ;;  %v224_v19 = vld [vmem:[%s3945_s3 + $0x8] sm:$0xff] }
 0x135   :  { %vm303_vm10 = vmor %vm301_vm8, %vm302_vm9  ;;  %vm586_vm9 = vcmask 195584  }
 0x136   :  { %v294_v25 = vsel %vm293_vm7, %v2689_v12, %v290_v21  ;;  %v297_v26 = vmul.f32 %v2691_v20, %v296_v22 }
 0x137   :  { %v306_v27 = vmul.f32 %v294_v25, %v2973_v37 }
 0x138   :  { %v298_v28 = vmul.f32 0.5, %v297_v26 }
 0x139   :  { %v312_v31 = vmul.f32 %v2681_v24, %v306_v27 }
 0x13a   :  { %v299_v32 = vsub.f32 1.5, %v298_v28 }
 0x13b   :  { %v346_v33 = vpack.c.bf16 %v312_v31, %v311_v29  ;;  %v241_v31 = vld [vmem:[%s3944_s2] sm:$0x1] }
 0x13c   :  { %v300_v34 = vmul.f32 %v2691_v20, %v299_v32  ;;  %vm242_vm13 = vcmp.gt.f32.partialorder %v241_v31, 0.0 }
 0x13d   :  { %484 = vmatmul.bf16.vlgmr.msra.gmra.mxu2 %v346_v33  ;;  %502 = vmatmul.bf16.vlgmr.msra.gmra.mxu3 %v346_v33 }
 0x13e   :  { %520 = vmatmul.bf16.vlgmr.msrb.gmra.mxu1 %v346_v33  ;;  %v304_v35 = vsel %vm303_vm10, %v2691_v20, %v300_v34  ;;  %v223_v20 = vld [vmem:[%s3945_s3] sm:$0xff]  ;;  %v214_v34 = vlaneseq }
 0x13f   :  { %v307_v36 = vmul.f32 %v304_v35, %v2977_v42 }
 0x141   :  { %v313_v38 = vmul.f32 %v2681_v24, %v307_v36 }
 0x143   :  { %v347_v39 = vpack.c.bf16 %v313_v38, %v313_v38 }
 0x14d   :  { %489 = vmatmul.bf16.gmra.mxu2 %v347_v39  ;;  %507 = vmatmul.bf16.gmra.mxu3 %v347_v39 }
 0x14e   :  { %525 = vmatmul.bf16.gmra.mxu1 %v347_v39 }
 0x1bb   :  { %v521_v40 = vpop.f32.mrf.mxu1 }
 0x1c0   :  { %v485_v41 = vpop.f32.mrf.mxu2  ;;  %v503_v43 = vpop.f32.mrf.mxu3 }
 0x1c1   :  { %v536_v45 = vpack.c.bf16 %v521_v40, %v503_v43  ;;  %v530_v55 = vmul.f32 0.17677669, %v485_v41  ;;  %v215_v40 = vshrl.u32 %v214_v34, 7  ;;  %v3190_v41 = vand.u32 127, %v214_v34 }
 0x1c2   :  { %v243_v43 = vsel %vm242_vm13, 1, %v2823_v50 }
 0x1c3   :  { %v523_v44 = vpop.f32.mrf.mxu1  ;;  %v550_v51 = vunpack.c.l.b16 %v536_v45  ;;  %v533_v58 = vpack.c.bf16 %v530_v55, %v530_v55  ;;  %v616_v15 = vunpack.c.h.b16 %v536_v45  ;;  %vm220_vm14 = vcmp.le.s32.totalorder %v3190_v41, %v215_v40 }
 0x1c4   :  { %v217_v50 = vadd.s32 16, %v215_v40 }
 0x1c5   :  { %v542_v1 = vunpack.c.l.b16 %v533_v58 }
 0x1c6   :  { %vm222_vm4 = vcmp.le.s32.totalorder %v3190_v41, %v217_v50 }
 0x1c8   :  { %v487_v46 = vpop.f32.mrf.mxu2  ;;  %v505_v47 = vpop.f32.mrf.mxu3 }
 0x1c9   :  { %v537_v48 = vpack.c.bf16 %v523_v44, %v505_v47  ;;  %v531_v49 = vmul.f32 0.17677669, %v487_v46  ;;  %v244_v44 = vperm.slane %v243_v43, 0 }
 0x1cb   :  { %v551_v52 = vunpack.c.l.b16 %v537_v48  ;;  %v526_v54 = vpop.f32.mrf.mxu1  ;;  %v534_v57 = vpack.c.bf16 %v531_v49, %v531_v49  ;;  %v617_v12 = vunpack.c.h.b16 %v537_v48  ;;  %vm3198_vm1 = vcmp.eq.s32.totalorder %v244_v44, 1 }
 0x1cd   :  { %v553_v56 = vpack.c.b16 %v551_v52, %v550_v51  ;;  %v543_v62 = vunpack.c.l.b16 %v534_v57  ;;  %v3159_v16 = vpack.c.b16 %v617_v12, %v616_v15  ;;  %v216_v51 = vadd.s32 8, %v215_v40 }
 0x1cf   :  { %660 = vrot.lane.b32.xlu2 %v553_v56, %s2824_s6  ;;  %v545_v3 = vpack.c.b16 %v543_v62, %v542_v1  ;;  %v563_v11 = vsel %vm555_vm11, %v553_v56, 0  ;;  %vm221_vm6 = vcmp.le.s32.totalorder %v3190_v41, %v216_v51 }
 0x1d0   :  { %v490_v59 = vpop.f32.mrf.mxu2  ;;  %v508_v60 = vpop.f32.mrf.mxu3 }
 0x1d1   :  { %v538_v61 = vpack.c.bf16 %v526_v54, %v508_v60  ;;  %v532_v7 = vmul.f32 0.17677669, %v490_v59  ;;  %v2827_v54 = vmov -1e+09  }
 0x1d3   :  { %v552_v63 = vunpack.c.l.b16 %v538_v61  ;;  %v528_v0 = vpop.f32.mrf.mxu1  ;;  %v618_v8 = vunpack.c.h.b16 %v538_v61  ;;  %v535_v9 = vpack.c.bf16 %v532_v7, %v532_v7 }
 0x1d5   :  { %v554_v2 = vpack.c.b16 %v552_v63, %v552_v63  ;;  %v3151_v10 = vpack.c.b16 %v618_v8, %v618_v8  ;;  %v544_v13 = vunpack.c.l.b16 %v535_v9 }
 0x1d7   :  { %767 = vrot.lane.b32.xlu0 %v554_v2, %s2825_s30  ;;  %662 = vrot.lane.b32.xlu1 %v554_v2, %s2824_s6  ;;  %v566_v4 = vsel %vm555_vm11, %v554_v2, 0  ;;  %v630_v14 = vsel %vm628_vm12, %v3151_v10, 0  ;;  %v546_v17 = vpack.c.b16 %v544_v13, %v544_v13 }
 0x1d8   :  { %656 = vrot.lane.b32.xlu2 %v545_v3, %s2824_s6  ;;  %v492_v5 = vpop.f32.mrf.mxu2  ;;  %v510_v6 = vpop.f32.mrf.mxu3  ;;  %574 = vmatpush.bf16.xpose.msrb.mxu0 %v566_v4 }
 0x1d9   :  { %2653 = vmatpush.bf16.xpose.msrb.mxu2 %v566_v4 }
 0x1df   :  { %870 = vrot.lane.b32.xlu1 %v553_v56, %s2826_s16  ;;  %761 = vrot.lane.b32.xlu0 %v545_v3, %s2825_s30 }
 0x1e0   :  { %872 = vrot.lane.b32.xlu2 %v554_v2, %s2826_s16  ;;  %575 = vmatpush.bf16.xpose.msrb.mxu0 %v563_v11 }
 0x1e1   :  { %2654 = vmatpush.bf16.xpose.msrb.mxu2 %v563_v11 }
 0x1e7   :  { %2226 = vmatmul.msk.bf16.vlgmr.msrb.gmra.mxu0 %vm555_vm11, %v545_v3  ;;  %868 = vrot.lane.b32.xlu0 %v546_v17, %s2826_s16 }
 0x1e8   :  { %763 = vrot.lane.b32.xlu1 %v546_v17, %s2825_s30  ;;  %658 = vrot.lane.b32.xlu2 %v546_v17, %s2824_s6 }
 0x1e9   :  { %638 = vmatpush.bf16.msra.mxu2 %v630_v14 }
 0x1ea   :  { %2227 = vmatmul.msk.bf16.vlgmr.msrb.gmra.mxu2 %vm555_vm11, %v546_v17 }
 0x1ed   :  { %639 = vmatpush.bf16.msra.mxu2 %v3159_v16 }
 0x1ef   :  { %233 = vperm.xlu0 %2665, %v225_v18  }
 0x1f0   :  { %230 = vperm.xlu1 %2664, %v224_v19   ;;  %765 = vrot.lane.b32.xlu2 %v553_v56, %s2825_s30 }
 0x1f7   :  { %723 = vrot.lane.b32.xlu0 %v3159_v16, %s2824_s6 }
 0x1f8   :  { %725 = vrot.lane.b32.xlu1 %v3151_v10, %s2824_s6  ;;  %866 = vrot.lane.b32.xlu2 %v545_v3, %s2826_s16 }
 0x200   :  { %227 = vperm.xlu2 %2663, %v223_v20  }
 0x229   :  { %v661_v21 = vpop.permute.xlu2 %660 }
 0x22a   :  { %v671_v38 = vsel %vm555_vm11, %v661_v21, 0 }
 0x232   :  { %v657_v22 = vpop.permute.xlu2 %656 }
 0x23a   :  { %v873_v23 = vpop.permute.xlu2 %872 }
 0x23b   :  { %v884_v39 = vsel %vm555_vm11, %v873_v23, 0 }
 0x242   :  { %v659_v24 = vpop.permute.xlu2 %658 }
 0x249   :  { %v768_v25 = vpop.permute.xlu0 %767  ;;  %v663_v26 = vpop.permute.xlu1 %662 }
 0x24a   :  { %v779_v27 = vsel %vm555_vm11, %v768_v25, 0  ;;  %v766_v28 = vpop.permute.xlu2 %765  ;;  %v674_v29 = vsel %vm555_vm11, %v663_v26, 0 }
 0x24b   :  { %682 = vmatpush.bf16.xpose.msrb.mxu3 %v674_v29  ;;  %787 = vmatpush.bf16.xpose.msra.mxu0 %v779_v27  ;;  %v776_v35 = vsel %vm555_vm11, %v766_v28, 0 }
 0x251   :  { %v871_v32 = vpop.permute.xlu1 %870  ;;  %v762_v33 = vpop.permute.xlu0 %761 }
 0x252   :  { %v867_v36 = vpop.permute.xlu2 %866  ;;  %v881_v48 = vsel %vm555_vm11, %v871_v32, 0 }
 0x253   :  { %683 = vmatpush.bf16.xpose.msrb.mxu3 %v671_v38  ;;  %788 = vmatpush.bf16.xpose.msra.mxu0 %v776_v35 }
 0x259   :  { %v869_v45 = vpop.permute.xlu0 %868 }
 0x25a   :  { %v764_v46 = vpop.permute.xlu1 %763  ;;  %2230 = vmatmul.msk.bf16.vlgmr.msrb.gmra.mxu3 %vm555_vm11, %v657_v22  ;;  %2234 = vmatmul.msk.bf16.vlgmr.msra.gmra.mxu0 %vm555_vm11, %v762_v33  ;;  %v228_v47 = vpop.permute.xlu2 %227 }
 0x25b   :  { %892 = vmatpush.bf16.xpose.msra.mxu3 %v884_v39  ;;  %vm235_vm15 = vcmp.ge.s32.totalorder %v3190_v41, %v228_v47 }
 0x25c   :  { %vm238_vm2 = vmand %vm220_vm14, %vm235_vm15 }
 0x25d   :  { %vm246_vm3 = vmand %vm238_vm2, %vm3198_vm1 }
 0x25e   :  { %v3205_v55 = vsel %vm246_vm3, 0.0, %v2827_v54 }
 0x261   :  { %v234_v52 = vpop.permute.xlu0 %233 }
 0x262   :  { %vm237_vm5 = vcmp.ge.s32.totalorder %v3190_v41, %v234_v52  ;;  %v231_v56 = vpop.permute.xlu1 %230 }
 0x263   :  { %893 = vmatpush.bf16.xpose.msra.mxu3 %v881_v48  ;;  %vm240_vm7 = vmand %vm222_vm4, %vm237_vm5  ;;  %vm236_vm8 = vcmp.ge.s32.totalorder %v3190_v41, %v231_v56 }
 0x264   :  { %v577_v57 = vpop.f32.mrf.mxu0  ;;  %vm239_vm10 = vmand %vm221_vm6, %vm236_vm8 }
 0x265   :  { %v578_v58 = vadd.f32 %v577_v57, %v3205_v55  ;;  %vm248_vm13 = vmand %vm240_vm7, %vm3198_vm1 }
 0x266   :  { %vm247_vm14 = vmand %vm239_vm10, %vm3198_vm1  ;;  %v3216_v60 = vsel %vm248_vm13, 0.0, %v2827_v54 }
 0x267   :  { %v587_v59 = vsel %vm586_vm9, %v578_v58, -inf  ;;  %v3218_v61 = vsel %vm247_vm14, 0.0, %v2827_v54 }
 0x268   :  { %588 = vmax.xlane.f32.xlu2 %v587_v59 }
 0x269   :  { %v724_v4 = vpop.permute.xlu0 %723 }
 0x26a   :  { %v726_v62 = vpop.permute.xlu1 %725  ;;  %2231 = vmatmul.msk.bf16.gmra.mxu3 %vm555_vm11, %v659_v24  ;;  %2235 = vmatmul.msk.bf16.gmra.mxu0 %vm555_vm11, %v764_v46 }
 0x26b   :  { %v735_v63 = vsel %vm628_vm12, %v726_v62, 0 }
 0x26c   :  { %743 = vmatpush.bf16.msra.mxu1 %v735_v63  ;;  %v579_v1 = vpop.f32.mrf.mxu0 }
 0x26d   :  { %v582_v0 = vpop.f32.mrf.mxu2  ;;  %v580_v3 = vadd.f32 %v579_v1, %v3218_v61 }
 0x26e   :  { %v583_v2 = vadd.f32 %v582_v0, %v3216_v60 }
 0x26f   :  { %v590_v5 = vsel %vm586_vm9, %v580_v3, -inf }
 0x270   :  { %744 = vmatpush.bf16.msra.mxu1 %v724_v4  ;;  %591 = vmax.xlane.f32.xlu1 %v590_v5  ;;  %v593_v6 = vsel %vm586_vm9, %v583_v2, -inf }
 0x271   :  { %594 = vmax.xlane.f32.xlu2 %v593_v6 }
 0x275   :  { %v584_v7 = vpop.f32.mrf.mxu2 }
 0x27a   :  { %2238 = vmatmul.msk.bf16.vlgmr.msra.gmra.mxu3 %vm555_vm11, %v867_v36 }
 0x28a   :  { %2239 = vmatmul.msk.bf16.gmra.mxu3 %vm555_vm11, %v869_v45 }
 0x2d7   :  { %v790_v8 = vpop.f32.mrf.mxu0 }
 0x2d8   :  { %v3230_v9 = vadd.f32 %v790_v8, %v3205_v55 }
 0x2da   :  { %v799_v11 = vsel %vm586_vm9, %v3230_v9, -inf }
 0x2db   :  { %800 = vmax.xlane.f32.xlu2 %v799_v11  ;;  %v589_v12 = vpop.xlane.xlu2 %588 }
 0x2dc   :  { %v596_v15 = vsub.f32 %v578_v58, %v589_v12 }
 0x2dd   :  { %v685_v13 = vpop.f32.mrf.mxu3 }
 0x2de   :  { %v3235_v14 = vadd.f32 %v685_v13, %v3205_v55  ;;  %v599_v21 = vmul.f32 1.442695, %v596_v15 }
 0x2df   :  { %v792_v17 = vpop.f32.mrf.mxu0 }
 0x2e0   :  { %v3238_v18 = vadd.f32 %v792_v17, %v3218_v61  ;;  %v694_v19 = vsel %vm586_vm9, %v3235_v14, -inf  ;;  %2692 = vpow2.f32 %v599_v21 }
 0x2e1   :  { %695 = vmax.xlane.f32.xlu0 %v694_v19 }
 0x2e2   :  { %v802_v20 = vsel %vm586_vm9, %v3238_v18, -inf }
 0x2e3   :  { %v592_v22 = vpop.xlane.xlu1 %591  ;;  %803 = vmax.xlane.f32.xlu1 %v802_v20 }
 0x2e4   :  { %v597_v23 = vsub.f32 %v580_v3, %v592_v22  ;;  %v595_v29 = vpop.xlane.xlu2 %594 }
 0x2e5   :  { %v687_v24 = vpop.f32.mrf.mxu3  ;;  %v598_v34 = vsub.f32 %v583_v2, %v595_v29 }
 0x2e6   :  { %v601_v25 = vmul.f32 1.442695, %v597_v23  ;;  %v3245_v26 = vadd.f32 %v687_v24, %v3218_v61  ;;  %v2693_v31 = vpop.eup %2692 }
 0x2e7   :  { %v795_v27 = vpop.f32.mrf.mxu0  ;;  %v603_v40 = vmul.f32 1.442695, %v598_v34  ;;  %v605_v57 = vsel %vm586_vm9, %v2693_v31, 0.0 }
 0x2e8   :  { %2694 = vpow2.f32 %v601_v25  ;;  %v697_v28 = vsel %vm586_vm9, %v3245_v26, -inf  ;;  %v3287_v56 = vadd.f32 %v795_v27, %v3216_v60 }
 0x2e9   :  { %698 = vmax.xlane.f32.xlu2 %v697_v28  ;;  %2696 = vpow2.f32 %v603_v40 }
 0x2ed   :  { %v690_v32 = vpop.f32.mrf.mxu3 }
 0x2ee   :  { %v3249_v33 = vpop.eup %2694  ;;  %v3252_v35 = vadd.f32 %v690_v32, %v3216_v60 }
 0x2ef   :  { %v614_v36 = vpack.c.bf16 %v3249_v33, %v2693_v31  ;;  %v797_v38 = vpop.f32.mrf.mxu0  ;;  %v3258_v44 = vpop.eup %2696 }
 0x2f0   :  { %v700_v39 = vsel %vm586_vm9, %v3252_v35, -inf  ;;  %v615_v47 = vpack.c.bf16 %v3258_v44, %v3258_v44 }
 0x2f1   :  { %2228 = vmatmul.msk.bf16.vlgmr.msra.gmra.mxu2 %vm586_vm9, %v614_v36  ;;  %701 = vmax.xlane.f32.xlu2 %v700_v39 }
 0x2f5   :  { %v692_v43 = vpop.f32.mrf.mxu3 }
 0x2fc   :  { %828 = vrot.lane.b32.xlu1 %v3159_v16, %s2825_s30 }
 0x2fd   :  { %v895_v45 = vpop.f32.mrf.mxu3 }
 0x2fe   :  { %v3263_v46 = vadd.f32 %v895_v45, %v3205_v55 }
 0x300   :  { %v904_v48 = vsel %vm586_vm9, %v3263_v46, -inf }
 0x301   :  { %905 = vmax.xlane.f32.xlu0 %v904_v48  ;;  %2229 = vmatmul.msk.bf16.gmra.mxu2 %vm586_vm9, %v615_v47 }
 0x304   :  { %933 = vrot.lane.b32.xlu1 %v3159_v16, %s2826_s16 }
 0x305   :  { %v897_v49 = vpop.f32.mrf.mxu3 }
 0x306   :  { %v3277_v52 = vadd.f32 %v897_v49, %v3218_v61 }
 0x308   :  { %v907_v54 = vsel %vm586_vm9, %v3277_v52, -inf }
 0x309   :  { %830 = vrot.lane.b32.xlu2 %v3151_v10, %s2825_s30 }
 0x30d   :  { %v900_v50 = vpop.f32.mrf.mxu3 }
 0x30e   :  { %v3282_v55 = vadd.f32 %v900_v50, %v3216_v60 }
 0x310   :  { %v910_v16 = vsel %vm586_vm9, %v3282_v55, -inf }
 0x315   :  { %v902_v51 = vpop.f32.mrf.mxu3  ;;  %935 = vrot.lane.b32.xlu0 %v3151_v10, %s2826_s16  ;;  %v805_v10 = vsel %vm586_vm9, %v3287_v56, -inf }
 0x332   :  { %908 = vmax.xlane.f32.xlu2 %v907_v54 }
 0x33a   :  { %911 = vmax.xlane.f32.xlu2 %v910_v16 }
 0x33f   :  { %806 = vmax.xlane.f32.xlu0 %v805_v10 }
 0x342   :  { %606 = vadd.xlane.f32.xlu2 %v605_v57 }
 0x34e   :  { %v801_v58 = vpop.xlane.xlu2 %800 }
 0x34f   :  { %v808_v59 = vsub.f32 %v3230_v9, %v801_v58 }
 0x351   :  { %v811_v61 = vmul.f32 1.442695, %v808_v59 }
 0x353   :  { %2698 = vpow2.f32 %v811_v61 }
 0x354   :  { %v696_v62 = vpop.xlane.xlu0 %695 }
 0x355   :  { %v703_v63 = vsub.f32 %v3235_v14, %v696_v62 }
 0x356   :  { %v804_v0 = vpop.xlane.xlu1 %803 }
 0x357   :  { %v706_v1 = vmul.f32 1.442695, %v703_v63  ;;  %v809_v60 = vsub.f32 %v3238_v18, %v804_v0  ;;  %v608_v18 = vsel %vm586_vm9, %v3249_v33, 0.0 }
 0x359   :  { %v2699_v2 = vpop.eup %2698  ;;  %2700 = vpow2.f32 %v706_v1  ;;  %v813_v3 = vmul.f32 1.442695, %v809_v60 }
 0x35a   :  { %v817_v4 = vsel %vm586_vm9, %v2699_v2, 0.0 }
 0x35b   :  { %2702 = vpow2.f32 %v813_v3  ;;  %818 = vadd.xlane.f32.xlu2 %v817_v4 }
 0x35c   :  { %v699_v5 = vpop.xlane.xlu2 %698 }
 0x35d   :  { %v704_v6 = vsub.f32 %v3245_v26, %v699_v5 }
 0x35f   :  { %v2701_v7 = vpop.eup %2700  ;;  %v708_v8 = vmul.f32 1.442695, %v704_v6 }
 0x360   :  { %v712_v9 = vsel %vm586_vm9, %v2701_v7, 0.0 }
 0x361   :  { %v2703_v11 = vpop.eup %2702  ;;  %2704 = vpow2.f32 %v708_v8  ;;  %713 = vadd.xlane.f32.xlu1 %v712_v9 }
 0x362   :  { %v820_v12 = vsel %vm586_vm9, %v2703_v11, 0.0  ;;  %v826_v24 = vpack.c.bf16 %v2703_v11, %v2699_v2 }
 0x363   :  { %821 = vadd.xlane.f32.xlu2 %v820_v12 }
 0x364   :  { %v702_v13 = vpop.xlane.xlu2 %701 }
 0x365   :  { %v705_v15 = vsub.f32 %v3252_v35, %v702_v13 }
 0x367   :  { %v2705_v14 = vpop.eup %2704  ;;  %v710_v20 = vmul.f32 1.442695, %v705_v15 }
 0x368   :  { %v721_v17 = vpack.c.bf16 %v2705_v14, %v2701_v7  ;;  %v715_v19 = vsel %vm586_vm9, %v2705_v14, 0.0 }
 0x369   :  { %609 = vadd.xlane.f32.xlu1 %v608_v18  ;;  %2706 = vpow2.f32 %v710_v20 }
 0x36a   :  { %2232 = vmatmul.msk.bf16.vlgmr.msra.gmra.mxu1 %vm586_vm9, %v721_v17 }
 0x36b   :  { %716 = vadd.xlane.f32.xlu2 %v715_v19 }
 0x36c   :  { %v831_v21 = vpop.permute.xlu2 %830 }
 0x36d   :  { %v840_v22 = vsel %vm628_vm12, %v831_v21, 0  ;;  %v611_v21 = vsel %vm586_vm9, %v3258_v44, 0.0 }
 0x36e   :  { %848 = vmatpush.bf16.msrb.mxu2 %v840_v22  ;;  %v829_v23 = vpop.permute.xlu1 %828 }
 0x36f   :  { %v2707_v27 = vpop.eup %2706 }
 0x370   :  { %v722_v31 = vpack.c.bf16 %v2707_v27, %v2707_v27  ;;  %v718_v58 = vsel %vm586_vm9, %v2707_v27, 0.0 }
 0x372   :  { %849 = vmatpush.bf16.msrb.mxu2 %v829_v23 }
 0x374   :  { %v906_v25 = vpop.xlane.xlu0 %905  ;;  %v3305_v26 = vpop.f32.mrf.mxu2 }
 0x375   :  { %v913_v28 = vsub.f32 %v3263_v46, %v906_v25  ;;  %2236 = vmatmul.msk.bf16.vlgmr.msrb.gmra.mxu2 %vm586_vm9, %v826_v24 }
 0x376   :  { %v934_v39 = vpop.permute.xlu1 %933 }
 0x377   :  { %v916_v29 = vmul.f32 1.442695, %v913_v28 }
 0x379   :  { %2708 = vpow2.f32 %v916_v29 }
 0x37a   :  { %2233 = vmatmul.msk.bf16.gmra.mxu1 %vm586_vm9, %v722_v31 }
 0x37c   :  { %v3310_v32 = vpop.f32.mrf.mxu2 }
 0x37f   :  { %v2709_v33 = vpop.eup %2708 }
 0x380   :  { %v922_v34 = vsel %vm586_vm9, %v2709_v33, 0.0 }
 0x381   :  { %923 = vadd.xlane.f32.xlu2 %v922_v34 }
 0x384   :  { %v3313_v35 = vpop.f32.mrf.mxu2 }
 0x387   :  { %v936_v36 = vpop.permute.xlu0 %935 }
 0x388   :  { %v945_v38 = vsel %vm628_vm12, %v936_v36, 0  ;;  %vm1013_vm12 = vcmask 785408  }
 0x389   :  { %953 = vmatpush.bf16.msrb.mxu1 %v945_v38 }
 0x38c   :  { %v648_v40 = vpop.f32.mrf.mxu2 }
 0x38d   :  { %954 = vmatpush.bf16.msrb.mxu1 %v934_v39 }
 0x3a5   :  { %v909_v43 = vpop.xlane.xlu2 %908 }
 0x3a6   :  { %v914_v45 = vsub.f32 %v3277_v52, %v909_v43 }
 0x3a8   :  { %v918_v46 = vmul.f32 1.442695, %v914_v45 }
 0x3aa   :  { %2710 = vpow2.f32 %v918_v46 }
 0x3ad   :  { %v912_v47 = vpop.xlane.xlu2 %911 }
 0x3ae   :  { %v915_v48 = vsub.f32 %v3282_v55, %v912_v47 }
 0x3b0   :  { %v2711_v49 = vpop.eup %2710  ;;  %v920_v50 = vmul.f32 1.442695, %v915_v48 }
 0x3b1   :  { %v931_v51 = vpack.c.bf16 %v2711_v49, %v2709_v33  ;;  %v925_v54 = vsel %vm586_vm9, %v2711_v49, 0.0 }
 0x3b2   :  { %2712 = vpow2.f32 %v920_v50  ;;  %v807_v16 = vpop.xlane.xlu0 %806  ;;  %926 = vadd.xlane.f32.xlu0 %v925_v54  ;;  %v2584_v54 = vld [vmem:[%s3950_s8 + $0x38] sm:$0xff] }
 0x3b3   :  { %v810_v10 = vsub.f32 %v3287_v56, %v807_v16  ;;  %2240 = vmatmul.msk.bf16.vlgmr.msrb.gmra.mxu1 %vm586_vm9, %v931_v51  ;;  %1083 = vmatpush.bf16.msrb.mxu0 %v2584_v54  ;;  %v2583_v16 = vld [vmem:[%s3950_s8 + $0x30] sm:$0xff]  ;;  %v2609_v54 = vld [vmem:[%s3952_s10 + $0xc4] sm:$0xf] }
 0x3b5   :  { %v815_v57 = vmul.f32 1.442695, %v810_v10  ;;  %v3326_v56 = vpop.xlane.xlu2 %606  ;;  %v2582_v10 = vld [vmem:[%s3950_s8 + $0x28] sm:$0xff] }
 0x3b7   :  { %2714 = vpow2.f32 %v815_v57  ;;  %1084 = vmatpush.bf16.msrb.mxu0 %v2583_v16  ;;  %v2581_v57 = vld [vmem:[%s3950_s8 + $0x20] sm:$0xff] }
 0x3b8   :  { %v2713_v52 = vpop.eup %2712 }
 0x3b9   :  { %v928_v59 = vsel %vm586_vm9, %v2713_v52, 0.0  ;;  %v932_v63 = vpack.c.bf16 %v2713_v52, %v2713_v52  ;;  %v2580_v52 = vld [vmem:[%s3950_s8 + $0x18] sm:$0xff] }
 0x3ba   :  { %719 = vadd.xlane.f32.xlu0 %v718_v58  ;;  %929 = vadd.xlane.f32.xlu1 %v928_v59  ;;  %v2579_v58 = vld [vmem:[%s3950_s8 + $0x10] sm:$0xff]  ;;  %v2578_v59 = vld [vmem:[%s3950_s8 + $0x8] sm:$0xff] }
 0x3bb   :  { %1085 = vmatpush.bf16.msrb.mxu0 %v2582_v10  ;;  %v2374_v10 = vld [vmem:[%s3952_s10 + $0xd0] sm:$0xf0] }
 0x3bd   :  { %v2715_v55 = vpop.eup %2714 }
 0x3be   :  { %v823_v61 = vsel %vm586_vm9, %v2715_v55, 0.0  ;;  %v827_v62 = vpack.c.bf16 %v2715_v55, %v2715_v55  ;;  %v2577_v55 = vld [vmem:[%s3950_s8] sm:$0xff] }
 0x3bf   :  { %824 = vadd.xlane.f32.xlu2 %v823_v61  ;;  %1086 = vmatpush.bf16.msrb.mxu0 %v2581_v57  ;;  %v2380_v57 = vld [vmem:[%s3952_s10 + $0xc8] sm:$0xf] }
 0x3c0   :  { %2237 = vmatmul.msk.bf16.gmra.mxu2 %vm586_vm9, %v827_v62 }
 0x3c3   :  { %2241 = vmatmul.msk.bf16.gmra.mxu1 %vm586_vm9, %v932_v63  ;;  %1087 = vmatpush.bf16.msrb.mxu0 %v2580_v52  ;;  %v2612_v52 = vld [vmem:[%s3952_s10 + $0xd4] sm:$0xf0] }
 0x3c7   :  { %1088 = vmatpush.bf16.msrb.mxu0 %v2579_v58  ;;  %v2377_v58 = vor.u32 %v2609_v54, %v2374_v10  ;;  %v2591_v54 = vld [vmem:[%s3952_s10 + $0x2c] sm:$0xf0] }
 0x3cb   :  { %1089 = vmatpush.bf16.msrb.mxu0 %v2578_v59  ;;  %v2381_v59 = vor.u32 %v2612_v52, %v2380_v57  ;;  %v2294_v57 = vld [vmem:[%s3952_s10 + $0x30] sm:$0xf0]  ;;  %v2300_v52 = vld [vmem:[%s3952_s10 + $0x28] sm:$0xf] }
 0x3ce   :  { %v819_v0 = vpop.xlane.xlu2 %818 }
 0x3cf   :  { %1090 = vmatpush.bf16.msrb.mxu0 %v2577_v55  ;;  %v2610_v55 = vld [vmem:[%s3952_s10 + $0xcc] sm:$0xf] }
 0x3d4   :  { %v714_v60 = vpop.xlane.xlu1 %713 }
 0x3d5   :  { %2716 = vrcp.f32 %v714_v60 }
 0x3d6   :  { %v822_v1 = vpop.xlane.xlu2 %821 }
 0x3db   :  { %v2717_v4 = vpop.eup %2716 }
 0x3dc   :  { %v610_v25 = vpop.xlane.xlu1 %609 }
 0x3de   :  { %v717_v2 = vpop.xlane.xlu2 %716 }
 0x3df   :  { %2718 = vrcp.f32 %v717_v2 }
 0x3e0   :  { %2720 = vrcp.f32 %v819_v0 }
 0x3e1   :  { %2722 = vrcp.f32 %v822_v1 }
 0x3e5   :  { %v2719_v5 = vpop.eup %2718 }
 0x3e6   :  { %v2721_v13 = vpop.eup %2720 }
 0x3e7   :  { %v746_v3 = vpop.f32.mrf.mxu1  ;;  %v2723_v15 = vpop.eup %2722 }
 0x3e8   :  { %v758_v7 = vmul.f32 %v2717_v4, %v746_v3 }
 0x3ef   :  { %v748_v6 = vpop.f32.mrf.mxu1 }
 0x3f0   :  { %v759_v8 = vmul.f32 %v2719_v5, %v748_v6 }
 0x3f2   :  { %v2666_v9 = vpack.i.bf16 %v759_v8, %v758_v7 }
 0x3f4   :  { %2667 = vrot.lane.b32.xlu0 %v2666_v9, %s2826_s16  ;;  %v924_v24 = vpop.xlane.xlu2 %923 }
 0x3f7   :  { %v751_v11 = vpop.f32.mrf.mxu1 }
 0x3f8   :  { %v851_v12 = vpop.f32.mrf.mxu2 }
 0x3f9   :  { %v863_v18 = vmul.f32 %v2721_v13, %v851_v12 }
 0x3ff   :  { %v753_v14 = vpop.f32.mrf.mxu1 }
 0x400   :  { %v853_v17 = vpop.f32.mrf.mxu2 }
 0x401   :  { %v864_v19 = vmul.f32 %v2723_v15, %v853_v17 }
 0x403   :  { %v2671_v20 = vpack.i.bf16 %v864_v19, %v863_v18 }
 0x405   :  { %2672 = vrot.lane.b32.xlu2 %v2671_v20, %s2825_s30 }
 0x41e   :  { %612 = vadd.xlane.f32.xlu0 %v611_v21 }
 0x425   :  { %v927_v22 = vpop.xlane.xlu0 %926 }
 0x42d   :  { %v720_v23 = vpop.xlane.xlu0 %719  ;;  %v930_v33 = vpop.xlane.xlu1 %929 }
 0x42e   :  { %2724 = vrcp.f32 %v720_v23 }
 0x42f   :  { %2726 = vrcp.f32 %v924_v24 }
 0x430   :  { %v956_v27 = vpop.f32.mrf.mxu1  ;;  %2728 = vrcp.f32 %v927_v22 }
 0x431   :  { %2730 = vrcp.f32 %v930_v33 }
 0x432   :  { %v825_v44 = vpop.xlane.xlu2 %824 }
 0x433   :  { %2732 = vrcp.f32 %v825_v44 }
 0x434   :  { %v2725_v28 = vpop.eup %2724  ;;  %2734 = vrcp.f32 %v3326_v56 }
 0x435   :  { %v760_v29 = vmul.f32 %v2725_v28, %v751_v11  ;;  %v2727_v31 = vpop.eup %2726  ;;  %2736 = vrcp.f32 %v610_v25 }
 0x436   :  { %v2729_v34 = vpop.eup %2728  ;;  %v968_v38 = vmul.f32 %v2727_v31, %v956_v27 }
 0x437   :  { %978 = vrot.lane.b32.xlu2 %v760_v29, %s2826_s16  ;;  %v2731_v43 = vpop.eup %2730 }
 0x438   :  { %v958_v36 = vpop.f32.mrf.mxu1 }
 0x439   :  { %v969_v39 = vmul.f32 %v2729_v34, %v958_v36  ;;  %v2733_v47 = vpop.eup %2732 }
 0x43a   :  { %v2735_v62 = vpop.eup %2734 }
 0x43b   :  { %v2676_v40 = vpack.i.bf16 %v969_v39, %v968_v38  ;;  %v2737_v63 = vpop.eup %2736  ;;  %v653_v60 = vmul.f32 %v2735_v62, %v3305_v26  ;;  %v2388_v38 = vld [vmem:[%s3952_s10 + $0xe0] sm:$0xf]  ;;  %v2613_v39 = vld [vmem:[%s3952_s10 + $0xe4] sm:$0xf] }
 0x43c   :  { %v654_v2 = vmul.f32 %v2737_v63, %v3310_v32  ;;  %v2356_v63 = vld [vmem:[%s3952_s10 + $0xa0] sm:$0xf] }
 0x43d   :  { %2677 = vrot.lane.b32.xlu1 %v2676_v40, %s2824_s6  ;;  %v2396_v40 = vld [vmem:[%s3952_s10 + $0xe8] sm:$0xf] }
 0x440   :  { %v961_v45 = vpop.f32.mrf.mxu1 }
 0x441   :  { %v970_v46 = vmul.f32 %v2731_v43, %v961_v45  ;;  %v2616_v43 = vld [vmem:[%s3952_s10 + $0xf4] sm:$0xf0] }
 0x443   :  { %v856_v48 = vpop.f32.mrf.mxu2  ;;  %1002 = vrot.lane.b32.xlu2 %v970_v46, %s2824_s6  ;;  %v2397_v46 = vor.u32 %v2616_v43, %v2396_v40  ;;  %v2310_v40 = vld [vmem:[%s3952_s10 + $0x50] sm:$0xf0]  ;;  %v2316_v43 = vld [vmem:[%s3952_s10 + $0x48] sm:$0xf] }
 0x444   :  { %v865_v49 = vmul.f32 %v2733_v47, %v856_v48  ;;  %v2614_v47 = vld [vmem:[%s3952_s10 + $0xec] sm:$0xf]  ;;  %v2398_v48 = vld [vmem:[%s3952_s10 + $0xf8] sm:$0xf0] }
 0x445   :  { %1389 = vmatpush.bf16.msra.mxu1 %v2397_v46 }
 0x446   :  { %990 = vrot.lane.b32.xlu1 %v865_v49, %s2825_s30  ;;  %v2401_v49 = vor.u32 %v2614_v47, %v2398_v48  ;;  %v2594_v48 = vld [vmem:[%s3952_s10 + $0x4c] sm:$0xf] }
 0x448   :  { %v963_v50 = vpop.f32.mrf.mxu1  ;;  %1407 = vmatpush.bf16.msra.mxu0 %v2401_v49  ;;  %v2318_v49 = vld [vmem:[%s3952_s10 + $0x58] sm:$0xf0] }
 0x449   :  { %v2372_v50 = vld [vmem:[%s3952_s10 + $0xc0] sm:$0xf]  ;;  %1390 = vmatpush.bf16.msra.mxu1 %v2381_v59 }
 0x44b   :  { %v858_v51 = vpop.f32.mrf.mxu2 }
 0x44c   :  { %v2611_v51 = vld [vmem:[%s3952_s10 + $0xcc] sm:$0xf0] }
 0x44d   :  { %v2373_v16 = vor.u32 %v2611_v51, %v2372_v50  ;;  %v2321_v50 = vor.u32 %v2594_v48, %v2318_v49  ;;  %v2292_v51 = vld [vmem:[%s3952_s10 + $0x20] sm:$0xf] }
 0x44e   :  { %v2293_v10 = vor.u32 %v2591_v54, %v2292_v51 }
 0x45f   :  { %v2673_v3 = vpop.permute.xlu2 %2672 }
 0x460   :  { %v2675_v7 = vunpack.i.h.bf16 %v2673_v3  ;;  %v2674_v8 = vunpack.i.l.bf16 %v2673_v3  ;;  %v2364_v3 = vld [vmem:[%s3952_s10 + $0xa8] sm:$0xf] }
 0x466   :  { %v2668_v61 = vpop.permute.xlu0 %2667 }
 0x467   :  { %v2670_v0 = vunpack.i.h.bf16 %v2668_v61  ;;  %v2669_v1 = vunpack.i.l.bf16 %v2668_v61  ;;  %v2382_v61 = vld [vmem:[%s3952_s10 + $0xd8] sm:$0xf0] }
 0x468   :  { %v2385_v62 = vor.u32 %v2610_v55, %v2382_v61  ;;  %v2590_v61 = vld [vmem:[%s3952_s10 + $0x2c] sm:$0xf] }
 0x469   :  { %v1008_v5 = vsel %vm555_vm11, %v654_v2, %v2670_v0  ;;  %v1007_v6 = vsel %vm555_vm11, %v653_v60, %v2669_v1  ;;  %v2607_v0 = vld [vmem:[%s3952_s10 + $0xac] sm:$0xf0]  ;;  %v2605_v1 = vld [vmem:[%s3952_s10 + $0xa4] sm:$0xf]  ;;  %v2358_v2 = vld [vmem:[%s3952_s10 + $0xb0] sm:$0xf0] }
 0x46a   :  { %v1010_v12 = vsel %vm171_vm0, %v1007_v6, %v2674_v8  ;;  %v1011_v13 = vsel %vm171_vm0, %v1008_v5, %v2675_v7  ;;  %1408 = vmatpush.bf16.msra.mxu0 %v2385_v62  ;;  %v2357_v60 = vor.u32 %v2607_v0, %v2356_v63  ;;  %v2361_v5 = vor.u32 %v2605_v1, %v2358_v2  ;;  %v2606_v7 = vld [vmem:[%s3952_s10 + $0xac] sm:$0xf]  ;;  %v2366_v8 = vld [vmem:[%s3952_s10 + $0xb8] sm:$0xf0]  ;;  %v2587_v2 = vld [vmem:[%s3952_s10 + $0xc] sm:$0xf0] }
 0x46b   :  { %v2302_v62 = vld [vmem:[%s3952_s10 + $0x38] sm:$0xf0] }
 0x46c   :  { %v2305_v0 = vor.u32 %v2590_v61, %v2302_v62  ;;  %v2630_v61 = vld [vmem:[%s3953_s11 + $0x68] sm:$0xff] }
 0x491   :  { %v613_v4 = vpop.xlane.xlu0 %612  ;;  %v979_v17 = vpop.permute.xlu2 %978 }
 0x492   :  { %2738 = vrcp.f32 %v613_v4  ;;  %v2608_v4 = vld [vmem:[%s3952_s10 + $0xb4] sm:$0xf0] }
 0x493   :  { %v2365_v6 = vor.u32 %v2608_v4, %v2364_v3  ;;  %v2585_v3 = vld [vmem:[%s3952_s10 + $0x4] sm:$0xf] }
 0x495   :  { %1391 = vmatpush.bf16.msra.mxu1 %v2365_v6  ;;  %v2284_v6 = vld [vmem:[%s3952_s10 + $0x8] sm:$0xf] }
 0x498   :  { %v2739_v15 = vpop.eup %2738 }
 0x499   :  { %v655_v18 = vmul.f32 %v2739_v15, %v3313_v35 }
 0x49b   :  { %v1009_v20 = vsel %vm555_vm11, %v655_v18, %v979_v17  ;;  %v2602_v18 = vld [vmem:[%s3952_s10 + $0x8c] sm:$0xf] }
 0x49d   :  { %v1003_v22 = vpop.permute.xlu2 %1002 }
 0x4af   :  { %v2678_v56 = vpop.permute.xlu1 %2677 }
 0x4b0   :  { %v2680_v9 = vunpack.i.h.bf16 %v2678_v56  ;;  %v2679_v11 = vunpack.i.l.bf16 %v2678_v56  ;;  %v2369_v56 = vor.u32 %v2606_v7, %v2366_v8  ;;  %v2588_v7 = vld [vmem:[%s3952_s10 + $0x14] sm:$0xf0] }
 0x4b2   :  { %v1014_v26 = vsel %vm1013_vm12, %v1010_v12, %v2679_v11  ;;  %v1015_v32 = vsel %vm1013_vm12, %v1011_v13, %v2680_v9  ;;  %v2340_v9 = vld [vmem:[%s3952_s10 + $0x80] sm:$0xf]  ;;  %v2603_v11 = vld [vmem:[%s3952_s10 + $0x8c] sm:$0xf0]  ;;  %v2601_v12 = vld [vmem:[%s3952_s10 + $0x84] sm:$0xf]  ;;  %1409 = vmatpush.bf16.msra.mxu0 %v2369_v56 }
 0x4b3   :  { %v1033_v14 = vpack.c.bf16 %v1015_v32, %v1014_v26  ;;  %v2341_v13 = vor.u32 %v2603_v11, %v2340_v9  ;;  %v2342_v26 = vld [vmem:[%s3952_s10 + $0x90] sm:$0xf0]  ;;  %v2348_v32 = vld [vmem:[%s3952_s10 + $0x88] sm:$0xf]  ;;  %v2285_v9 = vor.u32 %v2588_v7, %v2284_v6  ;;  %v2586_v11 = vld [vmem:[%s3952_s10 + $0xc] sm:$0xf] }
 0x4b4   :  { %v2345_v15 = vor.u32 %v2601_v12, %v2342_v26  ;;  %v2286_v12 = vld [vmem:[%s3952_s10 + $0x18] sm:$0xf0] }
 0x4b5   :  { %1091 = vmatmul.bf16.vlgmr.msrb.gmra.mxu0 %v1033_v14  ;;  %v2604_v14 = vld [vmem:[%s3952_s10 + $0x94] sm:$0xf0] }
 0x4b6   :  { %v2349_v17 = vor.u32 %v2604_v14, %v2348_v32 }
 0x4b8   :  { %v991_v19 = vpop.permute.xlu1 %990  ;;  %1392 = vmatpush.bf16.msra.mxu1 %v2349_v17 }
 0x4b9   :  { %v1012_v21 = vsel %vm171_vm0, %v1009_v20, %v991_v19  ;;  %v2350_v19 = vld [vmem:[%s3952_s10 + $0x98] sm:$0xf0] }
 0x4ba   :  { %v1016_v23 = vsel %vm1013_vm12, %v1012_v21, %v1003_v22  ;;  %v2353_v20 = vor.u32 %v2602_v18, %v2350_v19  ;;  %v2324_v21 = vld [vmem:[%s3952_s10 + $0x60] sm:$0xf]  ;;  %v2599_v22 = vld [vmem:[%s3952_s10 + $0x6c] sm:$0xf0] }
 0x4bb   :  { %v1034_v24 = vpack.c.bf16 %v1016_v23, %v1016_v23  ;;  %v2597_v23 = vld [vmem:[%s3952_s10 + $0x64] sm:$0xf] }
 0x4bc   :  { %1410 = vmatpush.bf16.msra.mxu0 %v2353_v20 }
 0x4c5   :  { %1096 = vmatmul.bf16.gmra.mxu0 %v1034_v24  ;;  %v2325_v24 = vor.u32 %v2599_v22, %v2324_v21 }
 0x532   :  { %v1092_v25 = vpop.f32.mrf.mxu0 }
 0x533   :  { %v3374_v27 = vadd.f32 %v1092_v25, %v2966_v30  ;;  %v2326_v25 = vld [vmem:[%s3952_s10 + $0x70] sm:$0xf0] }
 0x535   :  { %v1105_v28 = vmul.f32 %v3374_v27, %v3374_v27 }
 0x537   :  { %1108 = vadd.xlane.f32.xlu1 %v1105_v28  ;;  %v2332_v28 = vld [vmem:[%s3952_s10 + $0x68] sm:$0xf] }
 0x53a   :  { %v1094_v29 = vpop.f32.mrf.mxu0 }
 0x53b   :  { %v3379_v35 = vadd.f32 %v1094_v29, %v2973_v37  ;;  %v2615_v37 = vld [vmem:[%s3952_s10 + $0xec] sm:$0xf0]  ;;  %v2600_v29 = vld [vmem:[%s3952_s10 + $0x74] sm:$0xf0] }
 0x53c   :  { %v2389_v44 = vor.u32 %v2615_v37, %v2388_v38  ;;  %v2308_v37 = vld [vmem:[%s3952_s10 + $0x40] sm:$0xf] }
 0x53d   :  { %v1106_v31 = vmul.f32 %v3379_v35, %v3379_v35 }
 0x53e   :  { %1353 = vmatpush.bf16.msra.mxu2 %v2389_v44  ;;  %v2593_v44 = vld [vmem:[%s3952_s10 + $0x44] sm:$0xf] }
 0x53f   :  { %1110 = vadd.xlane.f32.xlu2 %v1106_v31  ;;  %v2329_v31 = vor.u32 %v2597_v23, %v2326_v25  ;;  %v2313_v46 = vor.u32 %v2593_v44, %v2310_v40  ;;  %v2682_v44 = vld [vmem:[%s3951_s9] ss:$0 sm:$0xff] }
 0x542   :  { %v1097_v33 = vpop.f32.mrf.mxu0  ;;  %1354 = vmatpush.bf16.msra.mxu2 %v2373_v16  ;;  %v2589_v16 = vld [vmem:[%s3952_s10 + $0x24] sm:$0xf] }
 0x543   :  { %v3384_v34 = vadd.f32 %v1097_v33, %v2977_v42  ;;  %v2390_v42 = vld [vmem:[%s3952_s10 + $0xf0] sm:$0xf0]  ;;  %v2333_v33 = vor.u32 %v2600_v29, %v2332_v28  ;;  %v2297_v59 = vor.u32 %v2589_v16, %v2294_v57  ;;  %v2624_v57 = vld [vmem:[%s3953_s11 + $0x38] sm:$0xff] }
 0x544   :  { %v2393_v45 = vor.u32 %v2613_v39, %v2390_v42  ;;  %v2595_v39 = vld [vmem:[%s3952_s10 + $0x4c] sm:$0xf0] }
 0x545   :  { %v1107_v30 = vmul.f32 %v3384_v34, %v3384_v34  ;;  %1393 = vmatpush.bf16.msra.mxu1 %v2333_v33  ;;  %v2309_v42 = vor.u32 %v2595_v39, %v2308_v37 }
 0x546   :  { %1371 = vmatpush.bf16.msrb.mxu3 %v2393_v45  ;;  %1355 = vmatpush.bf16.msra.mxu2 %v2357_v60  ;;  %v2596_v45 = vld [vmem:[%s3952_s10 + $0x54] sm:$0xf0]  ;;  %v2276_v60 = vld [vmem:[%s3952_s10] sm:$0xf] }
 0x547   :  { %1112 = vadd.xlane.f32.xlu0 %v1107_v30  ;;  %v2598_v30 = vld [vmem:[%s3952_s10 + $0x6c] sm:$0xf]  ;;  %v2317_v47 = vor.u32 %v2596_v45, %v2316_v43  ;;  %v2277_v4 = vor.u32 %v2587_v2, %v2276_v60 }
 0x549   :  { %1394 = vmatpush.bf16.msra.mxu1 %v2317_v47 }
 0x54a   :  { %v1099_v36 = vpop.f32.mrf.mxu0  ;;  %1372 = vmatpush.bf16.msrb.mxu3 %v2377_v58  ;;  %1356 = vmatpush.bf16.msra.mxu2 %v2341_v13  ;;  %v2592_v58 = vld [vmem:[%s3952_s10 + $0x34] sm:$0xf0]  ;;  %v2289_v13 = vor.u32 %v2586_v11, %v2286_v12 }
 0x54b   :  { %v2334_v36 = vld [vmem:[%s3952_s10 + $0x78] sm:$0xf0]  ;;  %v2301_v55 = vor.u32 %v2592_v58, %v2300_v52  ;;  %v2623_v58 = vld [vmem:[%s3953_s11 + $0x30] sm:$0xff] }
 0x54c   :  { %v2337_v38 = vor.u32 %v2598_v30, %v2334_v36  ;;  %v2632_v52 = vld [vmem:[%s3953_s11 + $0x78] sm:$0xff] }
 0x54d   :  { %1395 = vmatpush.bf16.msra.mxu1 %v2301_v55  ;;  %v2622_v55 = vld [vmem:[%s3953_s11 + $0x28] sm:$0xff] }
 0x54e   :  { %1373 = vmatpush.bf16.msrb.mxu3 %v2361_v5  ;;  %1357 = vmatpush.bf16.msra.mxu2 %v2325_v24  ;;  %v2278_v5 = vld [vmem:[%s3952_s10 + $0x10] sm:$0xf0] }
 0x54f   :  { %1411 = vmatpush.bf16.msra.mxu0 %v2337_v38  ;;  %v2281_v56 = vor.u32 %v2585_v3, %v2278_v5  ;;  %v2620_v3 = vld [vmem:[%s3953_s11 + $0x18] sm:$0xff] }
 0x551   :  { %1396 = vmatpush.bf16.msra.mxu1 %v2285_v9  ;;  %v2627_v9 = vld [vmem:[%s3953_s11 + $0x50] sm:$0xff] }
 0x552   :  { %1374 = vmatpush.bf16.msrb.mxu3 %v2345_v15  ;;  %1358 = vmatpush.bf16.msra.mxu2 %v2309_v42 }
 0x553   :  { %1412 = vmatpush.bf16.msra.mxu0 %v2321_v50 }
 0x556   :  { %1375 = vmatpush.bf16.msrb.mxu3 %v2329_v31  ;;  %1359 = vmatpush.bf16.msra.mxu2 %v2293_v10 }
 0x557   :  { %1413 = vmatpush.bf16.msra.mxu0 %v2305_v0  ;;  %v2621_v0 = vld [vmem:[%s3953_s11 + $0x20] sm:$0xff] }
 0x55a   :  { %1376 = vmatpush.bf16.msrb.mxu3 %v2313_v46  ;;  %1360 = vmatpush.bf16.msra.mxu2 %v2277_v4  ;;  %v2628_v4 = vld [vmem:[%s3953_s11 + $0x58] sm:$0xff] }
 0x55b   :  { %1414 = vmatpush.bf16.msra.mxu0 %v2289_v13  ;;  %v2618_v13 = vld [vmem:[%s3953_s11 + $0x8] sm:$0xff] }
 0x55e   :  { %1377 = vmatpush.bf16.msrb.mxu3 %v2297_v59  ;;  %1683 = vmatpush.bf16.msrb.mxu2 %v2624_v57  ;;  %v2631_v59 = vld [vmem:[%s3953_s11 + $0x70] sm:$0xff] }
 0x562   :  { %1378 = vmatpush.bf16.msrb.mxu3 %v2281_v56  ;;  %1684 = vmatpush.bf16.msrb.mxu2 %v2623_v58  ;;  %v2619_v56 = vld [vmem:[%s3953_s11 + $0x10] sm:$0xff] }
 0x566   :  { %1701 = vmatpush.bf16.msra.mxu3 %v2632_v52  ;;  %1685 = vmatpush.bf16.msrb.mxu2 %v2622_v55 }
 0x56a   :  { %1702 = vmatpush.bf16.msra.mxu3 %v2631_v59  ;;  %1686 = vmatpush.bf16.msrb.mxu2 %v2621_v0 }
 0x56e   :  { %1703 = vmatpush.bf16.msra.mxu3 %v2630_v61  ;;  %1687 = vmatpush.bf16.msrb.mxu2 %v2620_v3 }
 0x572   :  { %1688 = vmatpush.bf16.msrb.mxu2 %v2619_v56 }
 0x576   :  { %1689 = vmatpush.bf16.msrb.mxu2 %v2618_v13 }
 0x5aa   :  { %v1109_v63 = vpop.xlane.xlu1 %1108 }
 0x5ab   :  { %v1114_v1 = vmul.f32 %v1109_v63, %v3114_v53 }
 0x5ad   :  { %v1117_v8 = vadd.f32 1e-06, %v1114_v1  ;;  %v2629_v1 = vld [vmem:[%s3953_s11 + $0x60] sm:$0xff] }
 0x5ae   :  { %1704 = vmatpush.bf16.msra.mxu3 %v2629_v1 }
 0x5af   :  { %2740 = vrsqrt.f32 %v1117_v8  ;;  %vm1126_vm11 = vweird.f32 %v1117_v8 }
 0x5b2   :  { %v1111_v26 = vpop.xlane.xlu2 %1110  ;;  %1705 = vmatpush.bf16.msra.mxu3 %v2628_v4 }
 0x5b3   :  { %v1115_v32 = vmul.f32 %v1111_v26, %v3114_v53  ;;  %v2626_v26 = vld [vmem:[%s3953_s11 + $0x48] sm:$0xff] }
 0x5b5   :  { %v2741_v14 = vpop.eup %2740  ;;  %v1118_v15 = vadd.f32 1e-06, %v1115_v32 }
 0x5b6   :  { %v1121_v17 = vmul.f32 %v2741_v14, %v1117_v8  ;;  %vm1127_vm0 = vweird.f32 %v2741_v14  ;;  %1706 = vmatpush.bf16.msra.mxu3 %v2627_v9 }
 0x5b7   :  { %2742 = vrsqrt.f32 %v1118_v15  ;;  %vm1128_vm15 = vmor %vm1126_vm11, %vm1127_vm0  ;;  %vm1136_vm2 = vweird.f32 %v1118_v15 }
 0x5b8   :  { %v1122_v18 = vmul.f32 %v2741_v14, %v1121_v17 }
 0x5ba   :  { %v1123_v19 = vmul.f32 0.5, %v1122_v18  ;;  %v1113_v20 = vpop.xlane.xlu0 %1112  ;;  %1707 = vmatpush.bf16.msra.mxu3 %v2626_v26 }
 0x5bb   :  { %v1116_v21 = vmul.f32 %v1113_v20, %v3114_v53 }
 0x5bc   :  { %v1124_v22 = vsub.f32 1.5, %v1123_v19 }
 0x5bd   :  { %v2743_v23 = vpop.eup %2742  ;;  %v1119_v24 = vadd.f32 1e-06, %v1116_v21 }
 0x5be   :  { %v1131_v25 = vmul.f32 %v2743_v23, %v1118_v15  ;;  %v1125_v28 = vmul.f32 %v2741_v14, %v1124_v22  ;;  %vm1137_vm1 = vweird.f32 %v2743_v23  ;;  %v2617_v22 = vld [vmem:[%s3953_s11] sm:$0xff] }
 0x5bf   :  { %2744 = vrsqrt.f32 %v1119_v24  ;;  %vm1138_vm3 = vmor %vm1136_vm2, %vm1137_vm1  ;;  %vm1146_vm5 = vweird.f32 %v1119_v24  ;;  %1690 = vmatpush.bf16.msrb.mxu2 %v2617_v22 }
 0x5c0   :  { %v1132_v29 = vmul.f32 %v2743_v23, %v1131_v25  ;;  %v1129_v33 = vsel %vm1128_vm15, %v2741_v14, %v1125_v28 }
 0x5c1   :  { %v1150_v39 = vmul.f32 %v1129_v33, %v3374_v27 }
 0x5c2   :  { %v1133_v31 = vmul.f32 0.5, %v1132_v29 }
 0x5c3   :  { %v1156_v46 = vmul.f32 %v2682_v44, %v1150_v39 }
 0x5c4   :  { %v1134_v30 = vsub.f32 1.5, %v1133_v31 }
 0x5c5   :  { %v2745_v36 = vpop.eup %2744 }
 0x5c6   :  { %v1135_v38 = vmul.f32 %v2743_v23, %v1134_v30  ;;  %v1141_v37 = vmul.f32 %v2745_v36, %v1119_v24  ;;  %vm1147_vm4 = vweird.f32 %v2745_v36 }
 0x5c7   :  { %vm1148_vm6 = vmor %vm1146_vm5, %vm1147_vm4 }
 0x5c8   :  { %v1139_v42 = vsel %vm1138_vm3, %v2743_v23, %v1135_v38  ;;  %v1142_v40 = vmul.f32 %v2745_v36, %v1141_v37  ;;  %v2625_v23 = vld [vmem:[%s3953_s11 + $0x40] sm:$0xff] }
 0x5c9   :  { %v1151_v43 = vmul.f32 %v1139_v42, %v3379_v35  ;;  %1708 = vmatpush.bf16.msra.mxu3 %v2625_v23 }
 0x5ca   :  { %v1143_v45 = vmul.f32 0.5, %v1142_v40 }
 0x5cb   :  { %v1157_v47 = vmul.f32 %v2682_v44, %v1151_v43 }
 0x5cc   :  { %v1144_v48 = vsub.f32 1.5, %v1143_v45 }
 0x5cd   :  { %v1191_v49 = vpack.c.bf16 %v1157_v47, %v1156_v46 }
 0x5ce   :  { %v1145_v50 = vmul.f32 %v2745_v36, %v1144_v48 }
 0x5cf   :  { %1361 = vmatmul.bf16.vlgmr.msra.gmra.mxu2 %v1191_v49  ;;  %1379 = vmatmul.bf16.vlgmr.msrb.gmra.mxu3 %v1191_v49 }
 0x5d0   :  { %1397 = vmatmul.bf16.vlgmr.msra.gmra.mxu1 %v1191_v49  ;;  %1415 = vmatmul.bf16.vlgmr.msra.gmra.mxu0 %v1191_v49  ;;  %v1149_v51 = vsel %vm1148_vm6, %v2745_v36, %v1145_v50 }
 0x5d1   :  { %v1152_v54 = vmul.f32 %v1149_v51, %v3384_v34 }
 0x5d3   :  { %v1158_v16 = vmul.f32 %v2682_v44, %v1152_v54 }
 0x5d5   :  { %v1192_v10 = vpack.c.bf16 %v1158_v16, %v1158_v16 }
 0x5df   :  { %1366 = vmatmul.bf16.gmra.mxu2 %v1192_v10  ;;  %1384 = vmatmul.bf16.gmra.mxu3 %v1192_v10 }
 0x5e0   :  { %1402 = vmatmul.bf16.gmra.mxu1 %v1192_v10  ;;  %1420 = vmatmul.bf16.gmra.mxu0 %v1192_v10 }
 0x64d   :  { %v3607_v62 = vpop.f32.mrf.mxu1  ;;  %v3609_v63 = vpop.f32.mrf.mxu0 }
 0x652   :  { %v3617_v60 = vpop.f32.mrf.mxu2  ;;  %v3619_v2 = vpop.f32.mrf.mxu3 }
 0x653   :  { %v2402_v5 = vmul.f32 -1.442695, %v3617_v60  ;;  %v2403_v6 = vmul.f32 -1.442695, %v3619_v2 }
 0x655   :  { %2746 = vpow2.f32 %v2402_v5  ;;  %v3629_v7 = vpop.f32.mrf.mxu1  ;;  %v3631_v8 = vpop.f32.mrf.mxu0 }
 0x656   :  { %2748 = vpow2.f32 %v2403_v6 }
 0x65a   :  { %v3639_v11 = vpop.f32.mrf.mxu2  ;;  %v3641_v12 = vpop.f32.mrf.mxu3 }
 0x65b   :  { %v2747_v32 = vpop.eup %2746  ;;  %v2404_v14 = vmul.f32 -1.442695, %v3639_v11  ;;  %v2405_v18 = vmul.f32 -1.442695, %v3641_v12 }
 0x65c   :  { %v2749_v15 = vpop.eup %2748  ;;  %v1443_v17 = vadd.f32 1.0, %v2747_v32 }
 0x65d   :  { %v3651_v19 = vadd.f32 1.0, %v2749_v15  ;;  %2750 = vpow2.f32 %v2404_v14  ;;  %v3653_v20 = vpop.f32.mrf.mxu1  ;;  %v3655_v21 = vpop.f32.mrf.mxu0 }
 0x65e   :  { %2752 = vrcp.f32 %v1443_v17  ;;  %v1458_v54 = vand.u32 2147483647, %v1443_v17  ;;  %v1460_v16 = vand.u32 2147483648, %v1443_v17  ;;  %vm1454_vm8 = vweird.f32 %v1443_v17 }
 0x65f   :  { %2754 = vrcp.f32 %v3651_v19  ;;  %v1473_v57 = vand.u32 2147483647, %v3651_v19  ;;  %v1475_v59 = vand.u32 2147483648, %v3651_v19  ;;  %vm1469_vm14 = vweird.f32 %v3651_v19 }
 0x660   :  { %2756 = vpow2.f32 %v2405_v18  ;;  %vm1459_vm13 = vcmp.eq.f32.partialorder %v1458_v54, 8.507059e+37  ;;  %v1461_v4 = vor.u32 1.1754944e-38, %v1460_v16 }
 0x661   :  { %vm3696_vm12 = vcmp.eq.f32.partialorder %v1473_v57, 8.507059e+37  ;;  %v1476_v18 = vor.u32 1.1754944e-38, %v1475_v59 }
 0x662   :  { %v3664_v24 = vpop.f32.mrf.mxu2  ;;  %v3666_v25 = vpop.f32.mrf.mxu3 }
 0x663   :  { %v2751_v28 = vpop.eup %2750  ;;  %v2406_v29 = vmul.f32 -1.442695, %v3664_v24  ;;  %v2407_v30 = vmul.f32 -1.442695, %v3666_v25 }
 0x664   :  { %v2753_v31 = vpop.eup %2752  ;;  %v3669_v33 = vadd.f32 1.0, %v2751_v28 }
 0x665   :  { %v3672_v36 = vpop.eup %2754  ;;  %v1450_v38 = vmul.f32 %v2753_v31, %v1443_v17  ;;  %2758 = vpow2.f32 %v2406_v29  ;;  %v1405_v37 = vpop.f32.mrf.mxu1  ;;  %vm1455_vm7 = vweird.f32 %v2753_v31 }
 0x666   :  { %v1423_v39 = vpop.f32.mrf.mxu0  ;;  %v2757_v44 = vpop.eup %2756  ;;  %v1465_v42 = vmul.f32 %v3672_v36, %v3651_v19  ;;  %2760 = vrcp.f32 %v3669_v33  ;;  %vm3684_vm9 = vmor %vm1454_vm8, %vm1455_vm7  ;;  %vm1470_vm10 = vweird.f32 %v3672_v36  ;;  %v1488_v56 = vand.u32 2147483647, %v3669_v33 }
 0x667   :  { %v1451_v40 = vsub.f32 1.0, %v1450_v38  ;;  %v3677_v43 = vadd.f32 1.0, %v2757_v44  ;;  %2762 = vpow2.f32 %v2407_v30  ;;  %v1490_v9 = vand.u32 2147483648, %v3669_v33  ;;  %vm3703_vm0 = vmor %vm1469_vm14, %vm1470_vm10 }
 0x668   :  { %v1466_v45 = vsub.f32 1.0, %v1465_v42  ;;  %vm1484_vm15 = vweird.f32 %v3669_v33  ;;  %vm1489_vm3 = vcmp.eq.f32.partialorder %v1488_v56, 8.507059e+37 }
 0x669   :  { %v1452_v46 = vmul.f32 %v2753_v31, %v1451_v40  ;;  %2764 = vrcp.f32 %v3677_v43  ;;  %v1503_v23 = vand.u32 2147483647, %v3677_v43  ;;  %v1505_v28 = vand.u32 2147483648, %v3677_v43 }
 0x66a   :  { %v1467_v47 = vmul.f32 %v3672_v36, %v1466_v45  ;;  %v1369_v48 = vpop.f32.mrf.mxu2  ;;  %v1387_v49 = vpop.f32.mrf.mxu3  ;;  %v1491_v30 = vor.u32 1.1754944e-38, %v1490_v9  ;;  %vm1499_vm4 = vweird.f32 %v3677_v43 }
 0x66b   :  { %v2759_v50 = vpop.eup %2758  ;;  %v1453_v51 = vadd.f32 %v2753_v31, %v1452_v46  ;;  %vm1504_vm6 = vcmp.eq.f32.partialorder %v1503_v23, 8.507059e+37 }
 0x66c   :  { %v2761_v10 = vpop.eup %2760  ;;  %v3682_v52 = vadd.f32 1.0, %v2759_v50  ;;  %v1468_v1 = vadd.f32 %v3672_v36, %v1467_v47 }
 0x66d   :  { %v1480_v55 = vmul.f32 %v2761_v10, %v3669_v33  ;;  %v2763_v61 = vpop.eup %2762  ;;  %v1457_v0 = vsel %vm3684_vm9, %v2753_v31, %v1453_v51  ;;  %vm1485_vm11 = vweird.f32 %v2761_v10 }
 0x66e   :  { %2766 = vrcp.f32 %v3682_v52  ;;  %v1462_v26 = vsel %vm1459_vm13, %v1461_v4, %v1457_v0  ;;  %v3707_v15 = vadd.f32 1.0, %v2763_v61  ;;  %v1472_v17 = vsel %vm3703_vm0, %v3672_v36, %v1468_v1  ;;  %vm1486_vm1 = vmor %vm1484_vm15, %vm1485_vm11 }
 0x66f   :  { %v2765_v3 = vpop.eup %2764  ;;  %v1481_v5 = vsub.f32 1.0, %v1480_v55  ;;  %v1539_v31 = vmul.f32 %v1462_v26, %v3617_v60  ;;  %v1477_v36 = vsel %vm3696_vm12, %v1476_v18, %v1472_v17  ;;  %v1506_v60 = vor.u32 1.1754944e-38, %v1505_v28 }
 0x670   :  { %v1495_v13 = vmul.f32 %v2765_v3, %v3677_v43  ;;  %2768 = vrcp.f32 %v3707_v15  ;;  %vm1500_vm2 = vweird.f32 %v2765_v3  ;;  %v1540_v46 = vmul.f32 %v1477_v36, %v3619_v2  ;;  %v2532_v36 = vld [vmem:[%s3955_s13 + $0x78] sm:$0xf0] }
 0x671   :  { %v1482_v14 = vmul.f32 %v2761_v10, %v1481_v5  ;;  %vm1501_vm5 = vmor %vm1499_vm4, %vm1500_vm2  ;;  %v1545_v45 = vmul.f32 %v1539_v31, %v3607_v62  ;;  %v1520_v48 = vand.u32 2147483648, %v3682_v52  ;;  %vm1514_vm8 = vweird.f32 %v3682_v52 }
 0x672   :  { %v1496_v19 = vsub.f32 1.0, %v1495_v13  ;;  %v1518_v62 = vand.u32 2147483647, %v3682_v52  ;;  %v1546_v2 = vmul.f32 %v1540_v46, %v3609_v63  ;;  %v1535_v55 = vand.u32 2147483648, %v3707_v15  ;;  %v2644_v46 = vld [vmem:[%s3955_s13 + $0x54] sm:$0xf0] }
 0x673   :  { %v1483_v22 = vadd.f32 %v2761_v10, %v1482_v14  ;;  %v1521_v59 = vor.u32 1.1754944e-38, %v1520_v48  ;;  %v1533_v0 = vand.u32 2147483647, %v3707_v15  ;;  %vm1529_vm14 = vweird.f32 %v3707_v15 }
 0x674   :  { %v2767_v29 = vpop.eup %2766  ;;  %v1497_v38 = vmul.f32 %v2765_v3, %v1496_v19  ;;  %vm1519_vm13 = vcmp.eq.f32.partialorder %v1518_v62, 8.507059e+37  ;;  %v1536_v63 = vor.u32 1.1754944e-38, %v1535_v55  ;;  %v2498_v62 = vld [vmem:[%s3955_s13 + $0x30] sm:$0xf]  ;;  %v2490_v55 = vld [vmem:[%s3955_s13 + $0x20] sm:$0xf] }
 0x675   :  { %v1487_v37 = vsel %vm1486_vm1, %v2761_v10, %v1483_v22  ;;  %v1510_v33 = vmul.f32 %v2767_v29, %v3682_v52  ;;  %vm1515_vm7 = vweird.f32 %v2767_v29  ;;  %vm1534_vm0 = vcmp.eq.f32.partialorder %v1533_v0, 8.507059e+37 }
 0x676   :  { %v1492_v39 = vsel %vm1489_vm3, %v1491_v30, %v1487_v37  ;;  %v1498_v44 = vadd.f32 %v2765_v3, %v1497_v38  ;;  %v2769_v49 = vpop.eup %2768  ;;  %vm1516_vm9 = vmor %vm1514_vm8, %vm1515_vm7  ;;  %v2648_v30 = vld [vmem:[%s3955_s13 + $0x74] sm:$0xf0]  ;;  %v2647_v38 = vld [vmem:[%s3955_s13 + $0x74] sm:$0xf] }
 0x677   :  { %v1541_v42 = vmul.f32 %v1492_v39, %v3639_v11  ;;  %v1511_v40 = vsub.f32 1.0, %v1510_v33  ;;  %v1525_v11 = vmul.f32 %v2769_v49, %v3707_v15  ;;  %vm1530_vm10 = vweird.f32 %v2769_v49  ;;  %v2522_v33 = vld [vmem:[%s3955_s13 + $0x60] sm:$0xf]  ;;  %v2646_v39 = vld [vmem:[%s3955_s13 + $0x64] sm:$0xf0] }
 0x678   :  { %v1502_v47 = vsel %vm1501_vm5, %v2765_v3, %v1498_v44  ;;  %vm1531_vm12 = vmor %vm1529_vm14, %vm1530_vm10  ;;  %v2535_v37 = vor.u32 %v2647_v38, %v2532_v36  ;;  %v2645_v44 = vld [vmem:[%s3955_s13 + $0x64] sm:$0xf] }
 0x679   :  { %v1547_v50 = vmul.f32 %v1541_v42, %v3629_v7  ;;  %v1507_v51 = vsel %vm1504_vm6, %v1506_v60, %v1502_v47  ;;  %v1512_v54 = vmul.f32 %v2767_v29, %v1511_v40  ;;  %v1526_v58 = vsub.f32 1.0, %v1525_v11  ;;  %v2524_v60 = vld [vmem:[%s3955_s13 + $0x68] sm:$0xf0]  ;;  %v2643_v47 = vld [vmem:[%s3955_s13 + $0x54] sm:$0xf] }
 0x67a   :  { %v1542_v43 = vmul.f32 %v1507_v51, %v3641_v12  ;;  %1893 = vmatpush.bf16.msrb.mxu0 %v2535_v37  ;;  %v2523_v42 = vor.u32 %v2646_v39, %v2522_v33  ;;  %v2527_v40 = vor.u32 %v2645_v44, %v2524_v60  ;;  %v2506_v51 = vld [vmem:[%s3955_s13 + $0x40] sm:$0xf] }
 0x67b   :  { %v1583_v16 = vpack.c.bf16 %v1547_v50, %v1545_v45  ;;  %v1513_v10 = vadd.f32 %v2767_v29, %v1512_v54  ;;  %v1527_v61 = vmul.f32 %v2769_v49, %v1526_v58  ;;  %v2514_v45 = vld [vmem:[%s3955_s13 + $0x50] sm:$0xf]  ;;  %v2642_v54 = vld [vmem:[%s3955_s13 + $0x44] sm:$0xf0] }
 0x67c   :  { %v1548_v57 = vmul.f32 %v1542_v43, %v3631_v8  ;;  %v2515_v48 = vor.u32 %v2644_v46, %v2514_v45  ;;  %v2641_v43 = vld [vmem:[%s3955_s13 + $0x44] sm:$0xf]  ;;  %v2507_v11 = vor.u32 %v2642_v54, %v2506_v51  ;;  %v2683_v46 = vld [vmem:[%s3954_s12] ss:$0 sm:$0xff] }
 0x67d   :  { %v1517_v7 = vsel %vm1516_vm9, %v2767_v29, %v1513_v10  ;;  %1691 = vmatmul.bf16.vlgmr.msrb.gmra.mxu2 %v1583_v16  ;;  %v1528_v3 = vadd.f32 %v2769_v49, %v1527_v61  ;;  %v2508_v16 = vld [vmem:[%s3955_s13 + $0x48] sm:$0xf0]  ;;  %v2637_v61 = vld [vmem:[%s3955_s13 + $0x24] sm:$0xf]  ;;  %vm2011_vm9 = vcmask 7168  }
 0x67e   :  { %v1584_v12 = vpack.c.bf16 %v1548_v57, %v1546_v2  ;;  %v1522_v1 = vsel %vm1519_vm13, %v1521_v59, %v1517_v7  ;;  %1894 = vmatpush.bf16.msrb.mxu0 %v2527_v40  ;;  %v2511_v10 = vor.u32 %v2641_v43, %v2508_v16  ;;  %v2640_v2 = vld [vmem:[%s3955_s13 + $0x34] sm:$0xf0]  ;;  %v2639_v57 = vld [vmem:[%s3955_s13 + $0x34] sm:$0xf]  ;;  %v2500_v7 = vld [vmem:[%s3955_s13 + $0x38] sm:$0xf0] }
 0x67f   :  { %v1532_v8 = vsel %vm1531_vm12, %v2769_v49, %v1528_v3  ;;  %v1543_v52 = vmul.f32 %v1522_v1, %v3664_v24  ;;  %v2516_v49 = vld [vmem:[%s3955_s13 + $0x58] sm:$0xf0]  ;;  %v2499_v58 = vor.u32 %v2640_v2, %v2498_v62  ;;  %v2503_v59 = vor.u32 %v2639_v57, %v2500_v7  ;;  %v2492_v1 = vld [vmem:[%s3955_s13 + $0x28] sm:$0xf0] }
 0x680   :  { %1709 = vmatmul.bf16.vlgmr.msra.gmra.mxu3 %v1584_v12  ;;  %v1537_v4 = vsel %vm1534_vm0, %v1536_v63, %v1532_v8  ;;  %v2519_v50 = vor.u32 %v2643_v47, %v2516_v49  ;;  %v2638_v12 = vld [vmem:[%s3955_s13 + $0x24] sm:$0xf0]  ;;  %v2495_v3 = vor.u32 %v2637_v61, %v2492_v1  ;;  %v2482_v63 = vld [vmem:[%s3955_s13 + $0x10] sm:$0xf]  ;;  %v2636_v8 = vld [vmem:[%s3955_s13 + $0x14] sm:$0xf0] }
 0x681   :  { %v1544_v5 = vmul.f32 %v1537_v4, %v3666_v25  ;;  %v1549_v6 = vmul.f32 %v1543_v52, %v3653_v20  ;;  %v2491_v0 = vor.u32 %v2638_v12, %v2490_v55  ;;  %v2635_v52 = vld [vmem:[%s3955_s13 + $0x14] sm:$0xf]  ;;  %v2483_v4 = vor.u32 %v2636_v8, %v2482_v63 }
 0x682   :  { %1895 = vmatpush.bf16.msrb.mxu0 %v2519_v50  ;;  %v2828_v57 = vmov 0.0   ;;  %v3880_v12 = vld [vmem:[%s3946_s4 + $0x10] sm:$0xff] }
 0x683   :  { %v1550_v56 = vmul.f32 %v1544_v5, %v3655_v21  ;;  %v1585_v9 = vpack.c.bf16 %v1549_v6, %v1549_v6  ;;  %v2484_v5 = vld [vmem:[%s3955_s13 + $0x18] sm:$0xf0]  ;;  %vm1998_vm13 = vcmp.ge.s32.totalorder %v3880_v12, 0 }
 0x684   :  { %v2538_v63 = vsel %vm1998_vm13, 1.0, %v2828_v57 }
 0x685   :  { %v1586_v13 = vpack.c.bf16 %v1550_v56, %v1550_v56  ;;  %v2487_v56 = vor.u32 %v2635_v52, %v2484_v5  ;;  %v2026_v8 = vsel %vm2011_vm9, %v2538_v63, 0.0 }
 0x686   :  { %1896 = vmatpush.bf16.msrb.mxu0 %v2511_v10 }
 0x68a   :  { %1897 = vmatpush.bf16.msrb.mxu0 %v2503_v59 }
 0x68d   :  { %1696 = vmatmul.bf16.gmra.mxu2 %v1585_v9 }
 0x68e   :  { %1898 = vmatpush.bf16.msrb.mxu0 %v2495_v3 }
 0x690   :  { %1714 = vmatmul.bf16.gmra.mxu3 %v1586_v13  ;;  %v2474_v13 = vld [vmem:[%s3955_s13] sm:$0xf] }
 0x692   :  { %1899 = vmatpush.bf16.msrb.mxu0 %v2487_v56 }
 0x700   :  { %v1692_v26 = vpop.f32.mrf.mxu2 }
 0x703   :  { %v1710_v32 = vpop.f32.mrf.mxu3 }
 0x704   :  { %v1711_v14 = vadd.f32 %v1710_v32, %v1692_v26  ;;  %v2634_v26 = vld [vmem:[%s3955_s13 + $0x4] sm:$0xf0]  ;;  %v2633_v32 = vld [vmem:[%s3955_s13 + $0x4] sm:$0xf] }
 0x706   :  { %v3740_v15 = vadd.f32 %v1711_v14, %v3374_v27 }
 0x708   :  { %v1723_v24 = vmul.f32 %v3740_v15, %v3740_v15  ;;  %v1694_v17 = vpop.f32.mrf.mxu2 }
 0x70a   :  { %1726 = vadd.xlane.f32.xlu0 %v1723_v24  ;;  %v2475_v24 = vor.u32 %v2634_v26, %v2474_v13 }
 0x70b   :  { %v1712_v25 = vpop.f32.mrf.mxu3 }
 0x70c   :  { %v1713_v18 = vadd.f32 %v1712_v25, %v1694_v17  ;;  %v2476_v17 = vld [vmem:[%s3955_s13 + $0x8] sm:$0xf0] }
 0x70d   :  { %v2479_v25 = vor.u32 %v2633_v32, %v2476_v17 }
 0x70e   :  { %v3745_v20 = vadd.f32 %v1713_v18, %v3379_v35  ;;  %v2530_v35 = vld [vmem:[%s3955_s13 + $0x70] sm:$0xf] }
 0x70f   :  { %1900 = vmatpush.bf16.msrb.mxu0 %v2479_v25 }
 0x710   :  { %v1724_v21 = vmul.f32 %v3745_v20, %v3745_v20  ;;  %v1697_v19 = vpop.f32.mrf.mxu2 }
 0x712   :  { %1728 = vadd.xlane.f32.xlu0 %v1724_v21 }
 0x713   :  { %v1715_v22 = vpop.f32.mrf.mxu3 }
 0x714   :  { %v1716_v23 = vadd.f32 %v1715_v22, %v1697_v19 }
 0x716   :  { %v3750_v27 = vadd.f32 %v1716_v23, %v3384_v34  ;;  %v2531_v34 = vor.u32 %v2648_v30, %v2530_v35 }
 0x718   :  { %v1725_v28 = vmul.f32 %v3750_v27, %v3750_v27  ;;  %v1699_v29 = vpop.f32.mrf.mxu2  ;;  %1875 = vmatpush.bf16.msrb.mxu1 %v2531_v34 }
 0x71a   :  { %1730 = vadd.xlane.f32.xlu2 %v1725_v28 }
 0x71b   :  { %v1717_v31 = vpop.f32.mrf.mxu3 }
 0x71c   :  { %1876 = vmatpush.bf16.msrb.mxu1 %v2523_v42 }
 0x720   :  { %1877 = vmatpush.bf16.msrb.mxu1 %v2515_v48 }
 0x724   :  { %1878 = vmatpush.bf16.msrb.mxu1 %v2507_v11 }
 0x728   :  { %1879 = vmatpush.bf16.msrb.mxu1 %v2499_v58 }
 0x72c   :  { %1880 = vmatpush.bf16.msrb.mxu1 %v2491_v0 }
 0x730   :  { %1881 = vmatpush.bf16.msrb.mxu1 %v2483_v4 }
 0x734   :  { %1882 = vmatpush.bf16.msrb.mxu1 %v2475_v24 }
 0x77d   :  { %v1727_v6 = vpop.xlane.xlu0 %1726 }
 0x77e   :  { %v1732_v9 = vmul.f32 %v1727_v6, %v3114_v53 }
 0x780   :  { %v1735_v14 = vadd.f32 1e-06, %v1732_v9 }
 0x782   :  { %2770 = vrsqrt.f32 %v1735_v14  ;;  %vm1744_vm15 = vweird.f32 %v1735_v14 }
 0x785   :  { %v1729_v18 = vpop.xlane.xlu0 %1728 }
 0x786   :  { %v1733_v21 = vmul.f32 %v1729_v18, %v3114_v53 }
 0x788   :  { %v2771_v19 = vpop.eup %2770  ;;  %v1736_v22 = vadd.f32 1e-06, %v1733_v21 }
 0x789   :  { %v1739_v23 = vmul.f32 %v2771_v19, %v1735_v14  ;;  %vm1745_vm11 = vweird.f32 %v2771_v19 }
 0x78a   :  { %2772 = vrsqrt.f32 %v1736_v22  ;;  %vm1746_vm1 = vmor %vm1744_vm15, %vm1745_vm11  ;;  %vm1754_vm3 = vweird.f32 %v1736_v22 }
 0x78b   :  { %v1740_v28 = vmul.f32 %v2771_v19, %v1739_v23 }
 0x78d   :  { %v1741_v29 = vmul.f32 0.5, %v1740_v28  ;;  %v1731_v31 = vpop.xlane.xlu2 %1730 }
 0x78e   :  { %v1734_v35 = vmul.f32 %v1731_v31, %v3114_v53 }
 0x78f   :  { %v1742_v30 = vsub.f32 1.5, %v1741_v29 }
 0x790   :  { %v2773_v38 = vpop.eup %2772  ;;  %v1737_v34 = vadd.f32 1e-06, %v1734_v35 }
 0x791   :  { %v1749_v36 = vmul.f32 %v2773_v38, %v1736_v22  ;;  %v1743_v37 = vmul.f32 %v2771_v19, %v1742_v30  ;;  %vm1755_vm2 = vweird.f32 %v2773_v38 }
 0x792   :  { %2774 = vrsqrt.f32 %v1737_v34  ;;  %vm1756_vm4 = vmor %vm1754_vm3, %vm1755_vm2  ;;  %vm1764_vm6 = vweird.f32 %v1737_v34 }
 0x793   :  { %v1750_v33 = vmul.f32 %v2773_v38, %v1749_v36  ;;  %v1747_v44 = vsel %vm1746_vm1, %v2771_v19, %v1743_v37 }
 0x794   :  { %v1768_v53 = vmul.f32 %v1747_v44, %v3740_v15 }
 0x795   :  { %v1751_v39 = vmul.f32 0.5, %v1750_v33 }
 0x796   :  { %v1774_v51 = vmul.f32 %v2683_v46, %v1768_v53 }
 0x797   :  { %v1752_v42 = vsub.f32 1.5, %v1751_v39 }
 0x798   :  { %v2775_v60 = vpop.eup %2774 }
 0x799   :  { %v1753_v40 = vmul.f32 %v2773_v38, %v1752_v42  ;;  %v1759_v45 = vmul.f32 %v2775_v60, %v1737_v34  ;;  %vm1765_vm5 = vweird.f32 %v2775_v60  ;;  %v1965_v42 = vadd.s32 128, %v3190_v41 }
 0x79a   :  { %vm1766_vm7 = vmor %vm1764_vm6, %vm1765_vm5  ;;  %vm2050_vm6 = vcmask 0  }
 0x79b   :  { %v1757_v47 = vsel %vm1756_vm4, %v2773_v38, %v1753_v40  ;;  %v1760_v48 = vmul.f32 %v2775_v60, %v1759_v45 }
 0x79c   :  { %v1769_v49 = vmul.f32 %v1757_v47, %v3745_v20  ;;  %v3862_v20 = vld [vmem:[%s3946_s4] sm:$0xff] }
 0x79d   :  { %v1761_v50 = vmul.f32 0.5, %v1760_v48  ;;  %vm1996_vm8 = vcmp.ge.s32.totalorder %v3862_v20, 0 }
 0x79e   :  { %v1775_v54 = vmul.f32 %v2683_v46, %v1769_v49  ;;  %v2536_v58 = vsel %vm1996_vm8, 1.0, %v2828_v57 }
 0x79f   :  { %v1762_v43 = vsub.f32 1.5, %v1761_v50  ;;  %v2023_v7 = vsel %vm2011_vm9, %v2536_v58, 0.0 }
 0x7a0   :  { %v1793_v11 = vpack.c.bf16 %v1775_v54, %v1774_v51 }
 0x7a1   :  { %v1763_v16 = vmul.f32 %v2775_v60, %v1762_v43 }
 0x7a2   :  { %1883 = vmatmul.bf16.vlgmr.msrb.gmra.mxu1 %v1793_v11  ;;  %1901 = vmatmul.bf16.vlgmr.msrb.gmra.mxu0 %v1793_v11 }
 0x7a3   :  { %v1767_v15 = vsel %vm1766_vm7, %v2775_v60, %v1763_v16 }
 0x7a4   :  { %v1770_v10 = vmul.f32 %v1767_v15, %v3750_v27  ;;  %v3870_v27 = vld [vmem:[%s3946_s4 + $0x8] sm:$0xff] }
 0x7a5   :  { %vm1997_vm10 = vcmp.ge.s32.totalorder %v3870_v27, 0 }
 0x7a6   :  { %v1776_v62 = vmul.f32 %v2683_v46, %v1770_v10  ;;  %v2537_v59 = vsel %vm1997_vm10, 1.0, %v2828_v57 }
 0x7a7   :  { %v2024_v55 = vsel %vm2011_vm9, %v2537_v59, 0.0 }
 0x7a8   :  { %v1794_v2 = vpack.c.bf16 %v1776_v62, %v1776_v62  ;;  %v2025_v1 = vadd.f32 %v2024_v55, %v2023_v7 }
 0x7aa   :  { %v3892_v52 = vadd.f32 %v2026_v8, %v2025_v1 }
 0x7ac   :  { %v2028_v10 = vrot.slane %v3892_v52, 4 }
 0x7ae   :  { %v2029_v62 = vadd.f32 %v2028_v10, %v3892_v52 }
 0x7b2   :  { %1888 = vmatmul.bf16.gmra.mxu1 %v1794_v2  ;;  %1906 = vmatmul.bf16.gmra.mxu0 %v1794_v2  ;;  %v2030_v2 = vrot.slane %v2029_v62, 2 }
 0x7b4   :  { %v2031_v57 = vadd.f32 %v2030_v2, %v2029_v62 }
 0x7b6   :  { %v2032_v7 = vrot.slane %v2031_v57, 1 }
 0x7b8   :  { %v2033_v55 = vadd.f32 %v2032_v7, %v2031_v57 }
 0x81f   :  { %v1884_v61 = vpop.f32.mrf.mxu1  ;;  %v1902_v0 = vpop.f32.mrf.mxu0 }
 0x820   :  { %1911 = vst [vmem:[%s3956_s14] sm:$0xff] %v1884_v61  ;;  %v1920_v3 = vmax.f32 %v1884_v61, %v1902_v0 }
 0x821   :  { %1912 = vst [vmem:[%s3956_s14 + $0x8] sm:$0xff] %v1902_v0 }
 0x822   :  { %1921 = vmax.xlane.f32.xlu1 %v1920_v3 }
 0x827   :  { %v1886_v4 = vpop.f32.mrf.mxu1  ;;  %v1904_v5 = vpop.f32.mrf.mxu0 }
 0x828   :  { %1913 = vst [vmem:[%s3956_s14 + $0x10] sm:$0xff] %v1886_v4  ;;  %v1923_v6 = vmax.f32 %v1886_v4, %v1904_v5 }
 0x829   :  { %1914 = vst [vmem:[%s3956_s14 + $0x18] sm:$0xff] %v1904_v5 }
 0x82a   :  { %1924 = vmax.xlane.f32.xlu0 %v1923_v6 }
 0x82f   :  { %v1889_v56 = vpop.f32.mrf.mxu1  ;;  %v1907_v9 = vpop.f32.mrf.mxu0 }
 0x830   :  { %1915 = vst [vmem:[%s3956_s14 + $0x20] sm:$0xff] %v1889_v56  ;;  %v1926_v13 = vmax.f32 %v1889_v56, %v1907_v9 }
 0x831   :  { %1916 = vst [vmem:[%s3956_s14 + $0x28] sm:$0xff] %v1907_v9  ;;  %s2829_s14 = smov [#allocation2]  }
 0x832   :  { %1927 = vmax.xlane.f32.xlu2 %v1926_v13  ;;  %s2059_s18 = sshll.u32 %s2829_s14, 4  ;;  %s2060_s18 = int_to_ptr.vmem [resolvable:$true] %s2059_s18 }
 0x837   :  { %v1891_v26 = vpop.f32.mrf.mxu1  ;;  %v1909_v32 = vpop.f32.mrf.mxu0 }
 0x83b   :  { %1967 = vperm.xlu1 %2664, %v3862_v20  }
 0x83e   :  { %1970 = vperm.xlu0 %2665, %v3870_v27  }
 0x84a   :  { %1973 = vperm.xlu2 %2663, %v3880_v12  }
 0x895   :  { %v3909_v14 = vpop.xlane.xlu1 %1921 }
 0x896   :  { %v1929_v24 = vsub.f32 %v1884_v61, %v3909_v14  ;;  %v1930_v17 = vsub.f32 %v1902_v0, %v3909_v14 }
 0x898   :  { %v1935_v25 = vmul.f32 1.442695, %v1929_v24  ;;  %v1937_v18 = vmul.f32 1.442695, %v1930_v17 }
 0x89a   :  { %2776 = vpow2.f32 %v1935_v25 }
 0x89b   :  { %2778 = vpow2.f32 %v1937_v18 }
 0x89d   :  { %v3913_v21 = vpop.xlane.xlu0 %1924 }
 0x89e   :  { %v1931_v19 = vsub.f32 %v1886_v4, %v3913_v21  ;;  %v1932_v22 = vsub.f32 %v1904_v5, %v3913_v21 }
 0x8a0   :  { %v2777_v23 = vpop.eup %2776  ;;  %v1939_v28 = vmul.f32 1.442695, %v1931_v19  ;;  %v1941_v29 = vmul.f32 1.442695, %v1932_v22 }
 0x8a1   :  { %v2779_v31 = vpop.eup %2778 }
 0x8a2   :  { %2780 = vpow2.f32 %v1939_v28  ;;  %v1947_v35 = vadd.f32 %v2779_v31, %v2777_v23 }
 0x8a3   :  { %2782 = vpow2.f32 %v1941_v29 }
 0x8a4   :  { %1948 = vadd.xlane.f32.xlu0 %v1947_v35 }
 0x8a5   :  { %v3917_v30 = vpop.xlane.xlu2 %1927 }
 0x8a6   :  { %v1933_v38 = vsub.f32 %v1889_v56, %v3917_v30  ;;  %v1934_v34 = vsub.f32 %v1907_v9, %v3917_v30 }
 0x8a8   :  { %v2781_v36 = vpop.eup %2780  ;;  %v1943_v37 = vmul.f32 1.442695, %v1933_v38  ;;  %v1945_v33 = vmul.f32 1.442695, %v1934_v34 }
 0x8a9   :  { %v2783_v39 = vpop.eup %2782 }
 0x8aa   :  { %2784 = vpow2.f32 %v1943_v37  ;;  %v1950_v44 = vadd.f32 %v2783_v39, %v2781_v36 }
 0x8ab   :  { %2786 = vpow2.f32 %v1945_v33 }
 0x8ac   :  { %1951 = vadd.xlane.f32.xlu1 %v1950_v44 }
 0x8ad   :  { %v1968_v60 = vpop.permute.xlu1 %1967  ;;  %v1974_v49 = vpop.permute.xlu2 %1973 }
 0x8ae   :  { %vm1975_vm14 = vcmp.eq.s32.totalorder %v3190_v41, %v1968_v60  ;;  %vm1976_vm12 = vcmp.eq.s32.totalorder %v1965_v42, %v1968_v60  ;;  %vm1979_vm15 = vcmp.eq.s32.totalorder %v3190_v41, %v1974_v49  ;;  %vm1980_vm1 = vcmp.eq.s32.totalorder %v1965_v42, %v1974_v49 }
 0x8af   :  { %v1981_v40 = vsel %vm1975_vm14, %v1884_v61, 0.0  ;;  %v1982_v45 = vsel %vm1976_vm12, %v1902_v0, 0.0  ;;  %v1985_v11 = vsel %vm1979_vm15, %v1889_v56, 0.0  ;;  %v1986_v16 = vsel %vm1980_vm1, %v1907_v9, 0.0 }
 0x8b0   :  { %v2785_v53 = vpop.eup %2784  ;;  %v1971_v46 = vpop.permute.xlu0 %1970  ;;  %v1987_v47 = vadd.f32 %v1982_v45, %v1981_v40  ;;  %v1993_v15 = vadd.f32 %v1986_v16, %v1985_v11  ;;  %v2034_v0 = vmax.f32 %v2033_v55, 1.0 }
 0x8b1   :  { %v2787_v48 = vpop.eup %2786  ;;  %vm1977_vm0 = vcmp.eq.s32.totalorder %v3190_v41, %v1971_v46  ;;  %vm1978_vm11 = vcmp.eq.s32.totalorder %v1965_v42, %v1971_v46 }
 0x8b2   :  { %1988 = vadd.xlane.f32.xlu0 %v1987_v47  ;;  %v1953_v50 = vadd.f32 %v2787_v48, %v2785_v53  ;;  %v1983_v51 = vsel %vm1977_vm0, %v1886_v4, 0.0  ;;  %v1984_v54 = vsel %vm1978_vm11, %v1904_v5, 0.0  ;;  %vm2040_vm2 = vweird.f32 %v2034_v0 }
 0x8b3   :  { %v1990_v43 = vadd.f32 %v1984_v54, %v1983_v51  ;;  %v2046_v35 = vand.u32 2147483648, %v2034_v0  ;;  %v2044_v36 = vand.u32 2147483647, %v2034_v0 }
 0x8b4   :  { %1954 = vadd.xlane.f32.xlu2 %v1953_v50 }
 0x8b5   :  { %1991 = vadd.xlane.f32.xlu1 %v1990_v43  ;;  %vm2045_vm5 = vcmp.eq.f32.partialorder %v2044_v36, 8.507059e+37 }
 0x8bc   :  { %1994 = vadd.xlane.f32.xlu2 %v1993_v15 }
 0x917   :  { %v1949_v58 = vpop.xlane.xlu0 %1948 }
 0x918   :  { %2788 = vlog2.f32 %v1949_v58 }
 0x91e   :  { %v2789_v59 = vpop.eup %2788 }
 0x91f   :  { %v1952_v61 = vpop.xlane.xlu1 %1951  ;;  %v1957_v41 = vmul.f32 0.6931472, %v2789_v59 }
 0x920   :  { %2790 = vlog2.f32 %v1952_v61 }
 0x921   :  { %v1962_v1 = vadd.f32 %v1957_v41, %v3909_v14  ;;  %2792 = vrcp.f32 %v2034_v0 }
 0x925   :  { %v1989_v3 = vpop.xlane.xlu0 %1988 }
 0x926   :  { %v2791_v63 = vpop.eup %2790  ;;  %v2005_v4 = vsub.f32 %v1962_v1, %v1989_v3 }
 0x927   :  { %v1959_v8 = vmul.f32 0.6931472, %v2791_v63  ;;  %v1955_v5 = vpop.xlane.xlu2 %1954  ;;  %v2793_v13 = vpop.eup %2792 }
 0x928   :  { %2794 = vlog2.f32 %v1955_v5  ;;  %v1992_v52 = vpop.xlane.xlu1 %1991  ;;  %v2008_v56 = vsel %vm1996_vm8, %v2005_v4, 0.0  ;;  %v2036_v18 = vmul.f32 %v2793_v13, %v2034_v0  ;;  %vm2041_vm3 = vweird.f32 %v2793_v13 }
 0x929   :  { %v1963_v6 = vadd.f32 %v1959_v8, %v3913_v21  ;;  %v2012_v14 = vsel %vm2011_vm9, %v2008_v56, 0.0  ;;  %vm2042_vm4 = vmor %vm2040_vm2, %vm2041_vm3 }
 0x92a   :  { %v2037_v23 = vsub.f32 1.0, %v2036_v18 }
 0x92b   :  { %v2006_v9 = vsub.f32 %v1963_v6, %v1992_v52 }
 0x92c   :  { %v2038_v29 = vmul.f32 %v2793_v13, %v2037_v23 }
 0x92d   :  { %v2009_v26 = vsel %vm1997_vm10, %v2006_v9, 0.0 }
 0x92e   :  { %v2795_v32 = vpop.eup %2794  ;;  %v2013_v24 = vsel %vm2011_vm9, %v2009_v26, 0.0  ;;  %v2039_v34 = vadd.f32 %v2793_v13, %v2038_v29 }
 0x92f   :  { %v1961_v17 = vmul.f32 0.6931472, %v2795_v32  ;;  %v2014_v25 = vadd.f32 %v2013_v24, %v2012_v14  ;;  %v1995_v22 = vpop.xlane.xlu2 %1994 }
 0x930   :  { %v2043_v39 = vsel %vm2042_vm4, %v2793_v13, %v2039_v34 }
 0x931   :  { %v1964_v19 = vadd.f32 %v1961_v17, %v3917_v30  ;;  %v2047_v30 = vor.u32 1.1754944e-38, %v2046_v35 }
 0x933   :  { %v2007_v21 = vsub.f32 %v1964_v19, %v1995_v22  ;;  %v2048_v12 = vsel %vm2045_vm5, %v2047_v30, %v2043_v39 }
 0x935   :  { %v2010_v20 = vsel %vm1998_vm13, %v2007_v21, 0.0 }
 0x936   :  { %v2015_v28 = vsel %vm2011_vm9, %v2010_v20, 0.0 }
 0x937   :  { %v2016_v27 = vadd.f32 %v2015_v28, %v2014_v25 }
 0x939   :  { %v2017_v31 = vrot.slane %v2016_v27, 4 }
 0x93b   :  { %v2018_v38 = vadd.f32 %v2017_v31, %v2016_v27 }
 0x93d   :  { %v2019_v37 = vrot.slane %v2018_v38, 2 }
 0x93f   :  { %v2020_v33 = vadd.f32 %v2019_v37, %v2018_v38 }
 0x941   :  { %v2021_v44 = vrot.slane %v2020_v33, 1 }
 0x943   :  { %v2022_v42 = vadd.f32 %v2021_v44, %v2020_v33 }
 0x945   :  { %v2049_v60 = vmul.f32 %v2048_v12, %v2022_v42 }
 0x947   :  { %2051 = vst.msk [vmem:[#allocation2] sm:$0x1] %vm2050_vm6, %v2049_v60 }
 0x948   :  { %2064 = dma.vmem_to_hbm [thread:$0]  %s2060_s18, 16, %s2062_s20, [#allocation3]  }
 0x949   :  { %2820 = dma.done.wait [#allocation3], 16  }
 0x94a   :  { %2821 = vsyncadd [#allocation3], 4294967280 }
 0x94b   :  { %2071 = vsyncpa [#allocation3], 1 }

</bundles_post_ra>
